<compile_context>
chip_gen: v7x
topology: tpu7x:2x2x1
jax: 0.10.0
libtpu: 0.0.40
codegen_flags: <defaults>
</compile_context>

<pallas_src>
import math

import numpy as np

import jax
import jax.numpy as jnp
from jax.experimental import pallas as pl
from jax.experimental.pallas import tpu as pltpu


# ----------------------------------------------------------------------------
# Fused kernel: embedding gathers + single-head MHA (Q <- page, K=V <- offset)
# + final [pc | page | attn] concat, all on a flattened (n = b_blk*S) slab.
# ----------------------------------------------------------------------------
def encoder_kernel(pc_idx_ref, page_idx_ref, off_idx_ref, mask_ref,
                   pc_tbl_ref, page_tbl_ref, off_tbl_ref,
                   wq_ref, wkv_ref, wo_ref, bias_ref,
                   out_ref):
    n = out_ref.shape[0]
    e = wq_ref.shape[0]

    def gather(idx_ref, tbl_ref):
        # One-hot gather on the MXU: (n, V) @ (V, width).  Exact (rows are 0/1).
        tbl = tbl_ref[...]
        vocab = tbl.shape[0]
        onehot = (jax.lax.broadcasted_iota(jnp.int32, (n, vocab), 1)
                  == idx_ref[...]).astype(jnp.float32)
        return jnp.dot(onehot, tbl, preferred_element_type=jnp.float32)

    pc = gather(pc_idx_ref, pc_tbl_ref)          # (n, PC)
    page = gather(page_idx_ref, page_tbl_ref)    # (n, E)
    off = gather(off_idx_ref, off_tbl_ref)       # (n, E)

    bias = bias_ref[...]                         # (4, E): [bq*scale, bk, bv, bo]

    # Q projection (1/sqrt(E) already folded into wq/bq); fused K/V projection.
    q = jnp.dot(page, wq_ref[...], preferred_element_type=jnp.float32) + bias[0:1, :]
    kv = jnp.dot(off, wkv_ref[...], preferred_element_type=jnp.float32)
    k = kv[:, 0:e] + bias[1:2, :]
    v = kv[:, e:2 * e] + bias[2:3, :]

    # Flattened attention: one wide (n,E)x(E,n) push; additive block-diagonal mask
    # (0 inside a batch row, -1e30 across rows) keeps per-row softmax semantics.
    scores = jax.lax.dot_general(q, k, (((1,), (1,)), ((), ())),
                                 preferred_element_type=jnp.float32)
    scores = scores + mask_ref[...]
    scores = scores - jnp.max(scores, axis=-1, keepdims=True)
    p = jnp.exp(scores)
    l = jnp.sum(p, axis=-1, keepdims=True)

    attn = jnp.dot(p, v, preferred_element_type=jnp.float32)
    attn = attn * pl.reciprocal(l, approx=True)          # EUP slot, post-PV normalize

    out = jnp.dot(attn, wo_ref[...], preferred_element_type=jnp.float32) + bias[3:4, :]

    # Fused 80-wide store of lstm_inputs = [pc_embed | page_embed | attn_out].
    out_ref[...] = jnp.concatenate([pc, page, out], axis=-1).astype(out_ref.dtype)


# ----------------------------------------------------------------------------
# Generation-aware batch blocking
# ----------------------------------------------------------------------------
def _tensorcores_per_chip():
    try:
        kind = jax.devices()[0].device_kind.lower()
    except Exception:
        return 1
    if ("v7" in kind) or ("7x" in kind) or ("v4" in kind) or ("v5p" in kind):
        return 2        # megacore: shard grid steps across both TensorCores
    return 1            # v5e / v6e: the grid is a serial loop -> fewest steps wins


def _pick_b_blk(batch, seq_len, num_cores, n_cap=256):
    """Largest divisor of `batch` with b_blk*seq_len <= n_cap (keeps the flattened
    score tile small and matmul rows wide).  On multi-TC chips prefer an even number
    of grid steps so both cores get equal work; on 1-TC chips just minimize steps."""
    cap = max(1, n_cap // seq_len)
    ok = lambda d: batch % d == 0 and ((d * seq_len) % 8 == 0 or d == batch)
    divisors = [d for d in range(1, batch + 1) if ok(d) and d <= cap]
    if not divisors:
        divisors = [batch]
    if num_cores > 1:
        even = [d for d in divisors if (batch // d) % num_cores == 0]
        if even:
            return max(even)
    return max(divisors)


# ----------------------------------------------------------------------------
# Wrapper: builds specs, the block-diagonal mask, VMEM budget, cost hint.
# ----------------------------------------------------------------------------
def fused_encoder_pallas(pcs, pages, offsets, prepped):
    pc_table = prepped["pc_table"]
    page_table = prepped["page_table"]
    off_table = prepped["offset_table"]
    wq_t = prepped["wq_t_scaled"]
    wkv_t = prepped["wkv_t"]
    wo_t = prepped["wo_t"]
    bias4 = prepped["bias4"]

    B, S = pages.shape
    E = page_table.shape[1]
    PC = pc_table.shape[1]
    OUT = PC + 2 * E

    num_cores = _tensorcores_per_chip()
    b_blk = _pick_b_blk(B, S, num_cores)
    grid = (B // b_blk,)
    n = b_blk * S

    # Flatten indices to (B*S, 1) so every in-kernel op stays 2-D.
    pcs_f = pcs.reshape(B * S, 1).astype(jnp.int32)
    pages_f = pages.reshape(B * S, 1).astype(jnp.int32)
    offs_f = offsets.reshape(B * S, 1).astype(jnp.int32)

    # Precomputed additive block-diagonal mask for the flattened (n, n) scores.
    seg = np.repeat(np.arange(b_blk, dtype=np.int32), S)
    mask = jnp.asarray(
        np.where(seg[:, None] == seg[None, :], 0.0, -1e30).astype(np.float32))

    idx_spec = pl.BlockSpec((n, 1), lambda i: (i, 0))

    def const_spec(shape):
        return pl.BlockSpec(shape, lambda i: (0, 0))

    # Advisory cost estimate for XLA scheduling around the custom call.
    flops = int(B * S * (2 * (pc_table.shape[0] * PC + page_table.shape[0] * E
                              + off_table.shape[0] * E)
                         + 8 * E * E + 4 * n * E))
    transcendentals = int(B * S * n)
    bytes_accessed = int(4 * (3 * B * S + B * S * OUT + n * n
                              + pc_table.size + page_table.size + off_table.size
                              + wq_t.size + wkv_t.size + wo_t.size + bias4.size))
    cost = pl.CostEstimate(flops=flops, transcendentals=transcendentals,
                           bytes_accessed=bytes_accessed)

    # VMEM budget: params + mask resident once, double-buffered idx/out blocks,
    # generous headroom for in-kernel intermediates.  Capped well under v7x's 64 MiB.
    fixed = 4 * (pc_table.size + page_table.size + off_table.size
                 + wq_t.size + wkv_t.size + wo_t.size + bias4.size + n * n)
    per_step = 4 * (3 * n + n * OUT)
    scratch = 4 * (n * max(pc_table.shape[0], page_table.shape[0], off_table.shape[0])
                   + n * n + 6 * n * E)
    vmem_limit = int(min(48 << 20, max(16 << 20, 2 * (fixed + 2 * per_step + scratch))))

    out_flat = pl.pallas_call(
        encoder_kernel,
        out_shape=jax.ShapeDtypeStruct((B * S, OUT), jnp.float32),
        grid_spec=pltpu.PrefetchScalarGridSpec(
            num_scalar_prefetch=0,
            grid=grid,
            in_specs=[idx_spec, idx_spec, idx_spec,
                      const_spec((n, n)),
                      const_spec(pc_table.shape),
                      const_spec(page_table.shape),
                      const_spec(off_table.shape),
                      const_spec(wq_t.shape),           # (E, E)  wq^T * scale
                      const_spec(wkv_t.shape),          # (E, 2E) [wk^T | wv^T]
                      const_spec(wo_t.shape),           # (E, E)  wo^T
                      const_spec(bias4.shape)],         # (4, E)  row-packed biases
            out_specs=pl.BlockSpec((n, OUT), lambda i: (i, 0)),
        ),
        compiler_params=pltpu.CompilerParams(
            dimension_semantics=("parallel",),
            vmem_limit_bytes=vmem_limit),
        cost_estimate=cost,
    )(pcs_f, pages_f, offs_f, mask,
      pc_table, page_table, off_table, wq_t, wkv_t, wo_t, bias4)

    return out_flat.reshape(B, S, OUT)


# ----------------------------------------------------------------------------
# One-time parameter preparation: fold scale, transpose, row-pack biases.
# ----------------------------------------------------------------------------
def prepare_params(params):
    E = params["wq"].shape[0]
    scale = 1.0 / math.sqrt(E)   # head_dim == E for num_heads=1
    return {
        "pc_table": jnp.asarray(params["pc_table"], jnp.float32),
        "page_table": jnp.asarray(params["page_table"], jnp.float32),
        "offset_table": jnp.asarray(params["offset_table"], jnp.float32),
        "wq_t_scaled": (params["wq"] * scale).T,                              # (E, E)
        "wkv_t": jnp.concatenate([params["wk"].T, params["wv"].T], axis=1),   # (E, 2E)
        "wo_t": params["wo"].T,                                               # (E, E)
        "bias4": jnp.stack([params["bq"] * scale, params["bk"],
                            params["bv"], params["bo"]], axis=0),             # (4, E)
    }


# ----------------------------------------------------------------------------
# Forward pass (VoyagerEncoder.forward, default / else branch)
# ----------------------------------------------------------------------------
def voyager_encoder_forward(x, seq_len, prepped):
    pcs = x[:, :seq_len]
    pages = x[:, seq_len:2 * seq_len]
    offsets = x[:, 2 * seq_len:3 * seq_len]
    # lstm_inputs = cat([pc_embed, page_embed, MHA(page, off, off)], dim=2),
    # with the embedding gathers + attention + concat all inside the fused kernel.
    return fused_encoder_pallas(pcs, pages, offsets, prepped)
    # TODO(synk): use_contrastive / pc_localized branches need ContrastiveEncoder,
    # whose definition (and checkpoint) is not part of the given module source.


# ----------------------------------------------------------------------------
# Pure-JAX reference for correctness checking (uses the raw parameters)
# ----------------------------------------------------------------------------
def reference_forward(x, seq_len, params):
    pcs = x[:, :seq_len]
    pages = x[:, seq_len:2 * seq_len]
    offsets = x[:, 2 * seq_len:3 * seq_len]
    pc_embed = params["pc_table"][pcs]
    page_embed = params["page_table"][pages]
    off_embed = params["offset_table"][offsets]
    E = page_embed.shape[-1]
    q = page_embed @ params["wq"].T + params["bq"]
    k = off_embed @ params["wk"].T + params["bk"]
    v = off_embed @ params["wv"].T + params["bv"]
    s = (q / math.sqrt(E)) @ jnp.swapaxes(k, -1, -2)
    p = jax.nn.softmax(s, axis=-1)
    attn = p @ v
    out = attn @ params["wo"].T + params["bo"]
    return jnp.concatenate([pc_embed, page_embed, out], axis=-1)


def xavier_uniform(key, shape):
    fan_out, fan_in = shape          # PyTorch convention for 2-D weights
    bound = math.sqrt(6.0 / (fan_in + fan_out))
    return jax.random.uniform(key, shape, jnp.float32, -bound, bound)


if __name__ == "__main__":
    # --- small synthetic config (consistent with the module) --------------
    B = 16                   # batch_size
    S = 8                    # sequence_length
    pc_embed_size = 16
    lstm_size = 32
    page_embed_size = 32     # must equal lstm_size for the module's MHA to typecheck
    pc_vocab, page_vocab = 64, 128
    offset_bits = 6
    offset_size = 1 << offset_bits
    E = page_embed_size

    key = jax.random.PRNGKey(0)
    k_pc, k_page, k_off, k_inproj, k_outproj, k_in = jax.random.split(key, 6)

    in_proj = xavier_uniform(k_inproj, (3 * E, E))   # nn.MultiheadAttention.in_proj_weight
    params = {
        "pc_table": xavier_uniform(k_pc, (pc_vocab, pc_embed_size)),
        "page_table": xavier_uniform(k_page, (page_vocab, lstm_size)),
        "offset_table": xavier_uniform(k_off, (offset_size, lstm_size)),
        "wq": in_proj[:E],
        "wk": in_proj[E:2 * E],
        "wv": in_proj[2 * E:],
        "wo": xavier_uniform(k_outproj, (E, E)),     # out_proj.weight
        "bq": jnp.zeros((E,), jnp.float32),          # biases init'd to 0 in the module
        "bk": jnp.zeros((E,), jnp.float32),
        "bv": jnp.zeros((E,), jnp.float32),
        "bo": jnp.zeros((E,), jnp.float32),
    }
    prepped = prepare_params(params)                 # one-time fold/pack/transpose

    # input x: (B, 3*S) int32 token indices [pcs | pages | offsets]
    kp, kg, ko = jax.random.split(k_in, 3)
    pcs = jax.random.randint(kp, (B, S), 0, pc_vocab)
    pages = jax.random.randint(kg, (B, S), 0, page_vocab)
    offsets = jax.random.randint(ko, (B, S), 0, offset_size)
    x = jnp.concatenate([pcs, pages, offsets], axis=1).astype(jnp.int32)

    fwd = jax.jit(voyager_encoder_forward, static_argnums=(1,))
    out = fwd(x, S, prepped)
    out = jax.block_until_ready(out)

    ref = reference_forward(x, S, params)
    assert out.shape == (B, S, pc_embed_size + lstm_size + page_embed_size), out.shape
    # Tolerance loosened for pl.reciprocal(approx=True) in the softmax normalization.
    assert jnp.allclose(out, ref, rtol=2e-3, atol=2e-3), "mismatch vs reference"

    print("KERNEL_OK")
</pallas_src>

<mosaic_0001>
module attributes {stable_mosaic.version = 11 : i64} {
  func.func @encoder_kernel(%arg0: i32, %arg1: memref<128x1xi32, #tpu.memory_space<vmem>>, %arg2: memref<128x1xi32, #tpu.memory_space<vmem>>, %arg3: memref<128x1xi32, #tpu.memory_space<vmem>>, %arg4: memref<128x128xf32, #tpu.memory_space<vmem>>, %arg5: memref<64x16xf32, #tpu.memory_space<vmem>>, %arg6: memref<128x32xf32, #tpu.memory_space<vmem>>, %arg7: memref<64x32xf32, #tpu.memory_space<vmem>>, %arg8: memref<32x32xf32, #tpu.memory_space<vmem>>, %arg9: memref<32x64xf32, #tpu.memory_space<vmem>>, %arg10: memref<32x32xf32, #tpu.memory_space<vmem>>, %arg11: memref<4x32xf32, #tpu.memory_space<vmem>>, %arg12: memref<128x80xf32, #tpu.memory_space<vmem>>) attributes {dimension_semantics = [#tpu.dimension_semantics<parallel>], iteration_bounds = array<i64: 1>, scalar_prefetch = 0 : i64, scratch_operands = 0 : i64, tpu.core_type = #tpu.core_type<tc>, window_params = [{transform_indices = @transform_0, window_bounds = array<i64: 128, 1>}, {transform_indices = @transform_1, window_bounds = array<i64: 128, 1>}, {transform_indices = @transform_2, window_bounds = array<i64: 128, 1>}, {pipeline_mode = #tpu.pipeline_mode<synchronous>, transform_indices = @transform_3, window_bounds = array<i64: 128, 128>}, {pipeline_mode = #tpu.pipeline_mode<synchronous>, transform_indices = @transform_4, window_bounds = array<i64: 64, 16>}, {pipeline_mode = #tpu.pipeline_mode<synchronous>, transform_indices = @transform_5, window_bounds = array<i64: 128, 32>}, {pipeline_mode = #tpu.pipeline_mode<synchronous>, transform_indices = @transform_6, window_bounds = array<i64: 64, 32>}, {pipeline_mode = #tpu.pipeline_mode<synchronous>, transform_indices = @transform_7, window_bounds = array<i64: 32, 32>}, {pipeline_mode = #tpu.pipeline_mode<synchronous>, transform_indices = @transform_8, window_bounds = array<i64: 32, 64>}, {pipeline_mode = #tpu.pipeline_mode<synchronous>, transform_indices = @transform_9, window_bounds = array<i64: 32, 32>}, {pipeline_mode = #tpu.pipeline_mode<synchronous>, transform_indices = @transform_10, window_bounds = array<i64: 4, 32>}, {transform_indices = @transform_11, window_bounds = array<i64: 128, 80>}]} {
    %c0 = arith.constant 0 : index
    %c0_0 = arith.constant 0 : index
    %0 = vector.load %arg5[%c0, %c0_0] : memref<64x16xf32, #tpu.memory_space<vmem>>, vector<64x16xf32>
    %1 = tpu.iota {dimensions = array<i32: 1>} : vector<128x64xi32>
    %c0_1 = arith.constant 0 : index
    %c0_2 = arith.constant 0 : index
    %2 = vector.load %arg1[%c0_1, %c0_2] : memref<128x1xi32, #tpu.memory_space<vmem>>, vector<128x1xi32>
    %3 = vector.broadcast %2 : vector<128x1xi32> to vector<128x64xi32>
    %4 = arith.cmpi eq, %1, %3 : vector<128x64xi32>
    %5 = arith.extui %4 : vector<128x64xi1> to vector<128x64xi32>
    %6 = arith.sitofp %5 : vector<128x64xi32> to vector<128x64xf32>
    %cst = arith.constant dense<0.000000e+00> : vector<128x16xf32>
    %7 = tpu.matmul %6, %0, %cst {dimension_numbers = #tpu.dot_dimension_numbers<[1], [0], [0], [1], [0, 0, 1, 1], [], []>} : vector<128x64xf32>, vector<64x16xf32>, vector<128x16xf32> -> vector<128x16xf32>
    %c0_3 = arith.constant 0 : index
    %c0_4 = arith.constant 0 : index
    %8 = vector.load %arg6[%c0_3, %c0_4] : memref<128x32xf32, #tpu.memory_space<vmem>>, vector<128x32xf32>
    %9 = tpu.iota {dimensions = array<i32: 1>} : vector<128x128xi32>
    %c0_5 = arith.constant 0 : index
    %c0_6 = arith.constant 0 : index
    %10 = vector.load %arg2[%c0_5, %c0_6] : memref<128x1xi32, #tpu.memory_space<vmem>>, vector<128x1xi32>
    %11 = vector.broadcast %10 : vector<128x1xi32> to vector<128x128xi32>
    %12 = arith.cmpi eq, %9, %11 : vector<128x128xi32>
    %13 = arith.extui %12 : vector<128x128xi1> to vector<128x128xi32>
    %14 = arith.sitofp %13 : vector<128x128xi32> to vector<128x128xf32>
    %cst_7 = arith.constant dense<0.000000e+00> : vector<128x32xf32>
    %15 = tpu.matmul %14, %8, %cst_7 {dimension_numbers = #tpu.dot_dimension_numbers<[1], [0], [0], [1], [0, 0, 1, 1], [], []>} : vector<128x128xf32>, vector<128x32xf32>, vector<128x32xf32> -> vector<128x32xf32>
    %c0_8 = arith.constant 0 : index
    %c0_9 = arith.constant 0 : index
    %16 = vector.load %arg7[%c0_8, %c0_9] : memref<64x32xf32, #tpu.memory_space<vmem>>, vector<64x32xf32>
    %17 = tpu.iota {dimensions = array<i32: 1>} : vector<128x64xi32>
    %c0_10 = arith.constant 0 : index
    %c0_11 = arith.constant 0 : index
    %18 = vector.load %arg3[%c0_10, %c0_11] : memref<128x1xi32, #tpu.memory_space<vmem>>, vector<128x1xi32>
    %19 = vector.broadcast %18 : vector<128x1xi32> to vector<128x64xi32>
    %20 = arith.cmpi eq, %17, %19 : vector<128x64xi32>
    %21 = arith.extui %20 : vector<128x64xi1> to vector<128x64xi32>
    %22 = arith.sitofp %21 : vector<128x64xi32> to vector<128x64xf32>
    %cst_12 = arith.constant dense<0.000000e+00> : vector<128x32xf32>
    %23 = tpu.matmul %22, %16, %cst_12 {dimension_numbers = #tpu.dot_dimension_numbers<[1], [0], [0], [1], [0, 0, 1, 1], [], []>} : vector<128x64xf32>, vector<64x32xf32>, vector<128x32xf32> -> vector<128x32xf32>
    %c0_13 = arith.constant 0 : index
    %c0_14 = arith.constant 0 : index
    %24 = vector.load %arg11[%c0_13, %c0_14] : memref<4x32xf32, #tpu.memory_space<vmem>>, vector<4x32xf32>
    %c0_15 = arith.constant 0 : index
    %c0_16 = arith.constant 0 : index
    %25 = vector.load %arg8[%c0_15, %c0_16] : memref<32x32xf32, #tpu.memory_space<vmem>>, vector<32x32xf32>
    %cst_17 = arith.constant dense<0.000000e+00> : vector<128x32xf32>
    %26 = tpu.matmul %15, %25, %cst_17 {dimension_numbers = #tpu.dot_dimension_numbers<[1], [0], [0], [1], [0, 0, 1, 1], [], []>} : vector<128x32xf32>, vector<32x32xf32>, vector<128x32xf32> -> vector<128x32xf32>
    %27 = vector.extract_strided_slice %24 {offsets = [0, 0], sizes = [1, 32], strides = [1, 1]} : vector<4x32xf32> to vector<1x32xf32>
    %28 = vector.broadcast %27 : vector<1x32xf32> to vector<128x32xf32>
    %29 = arith.addf %26, %28 : vector<128x32xf32>
    %c0_18 = arith.constant 0 : index
    %c0_19 = arith.constant 0 : index
    %30 = vector.load %arg9[%c0_18, %c0_19] : memref<32x64xf32, #tpu.memory_space<vmem>>, vector<32x64xf32>
    %cst_20 = arith.constant dense<0.000000e+00> : vector<128x64xf32>
    %31 = tpu.matmul %23, %30, %cst_20 {dimension_numbers = #tpu.dot_dimension_numbers<[1], [0], [0], [1], [0, 0, 1, 1], [], []>} : vector<128x32xf32>, vector<32x64xf32>, vector<128x64xf32> -> vector<128x64xf32>
    %32 = vector.extract_strided_slice %31 {offsets = [0, 0], sizes = [128, 32], strides = [1, 1]} : vector<128x64xf32> to vector<128x32xf32>
    %33 = vector.extract_strided_slice %24 {offsets = [1, 0], sizes = [1, 32], strides = [1, 1]} : vector<4x32xf32> to vector<1x32xf32>
    %34 = vector.broadcast %33 : vector<1x32xf32> to vector<128x32xf32>
    %35 = arith.addf %32, %34 : vector<128x32xf32>
    %36 = vector.extract_strided_slice %31 {offsets = [0, 32], sizes = [128, 32], strides = [1, 1]} : vector<128x64xf32> to vector<128x32xf32>
    %37 = vector.extract_strided_slice %24 {offsets = [2, 0], sizes = [1, 32], strides = [1, 1]} : vector<4x32xf32> to vector<1x32xf32>
    %38 = vector.broadcast %37 : vector<1x32xf32> to vector<128x32xf32>
    %39 = arith.addf %36, %38 : vector<128x32xf32>
    %cst_21 = arith.constant dense<0.000000e+00> : vector<128x128xf32>
    %40 = tpu.matmul %29, %35, %cst_21 {dimension_numbers = #tpu.dot_dimension_numbers<[1], [1], [0], [0], [0, 0, 1, 0], [], []>} : vector<128x32xf32>, vector<128x32xf32>, vector<128x128xf32> -> vector<128x128xf32>
    %c0_22 = arith.constant 0 : index
    %c0_23 = arith.constant 0 : index
    %41 = vector.load %arg4[%c0_22, %c0_23] : memref<128x128xf32, #tpu.memory_space<vmem>>, vector<128x128xf32>
    %42 = arith.addf %40, %41 : vector<128x128xf32>
    %cst_24 = arith.constant dense<0xFF800000> : vector<128xf32>
    %43 = vector.multi_reduction <maximumf>, %42, %cst_24 [1] : vector<128x128xf32> to vector<128xf32>
    %44 = vector.shape_cast %43 : vector<128xf32> to vector<128x1xf32>
    %45 = vector.broadcast %44 : vector<128x1xf32> to vector<128x128xf32>
    %46 = arith.subf %42, %45 : vector<128x128xf32>
    %47 = math.exp %46 : vector<128x128xf32>
    %cst_25 = arith.constant dense<0.000000e+00> : vector<128xf32>
    %48 = vector.multi_reduction <add>, %47, %cst_25 [1] : vector<128x128xf32> to vector<128xf32>
    %49 = vector.shape_cast %48 : vector<128xf32> to vector<128x1xf32>
    %cst_26 = arith.constant dense<0.000000e+00> : vector<128x32xf32>
    %50 = tpu.matmul %47, %39, %cst_26 {dimension_numbers = #tpu.dot_dimension_numbers<[1], [0], [0], [1], [0, 0, 1, 1], [], []>} : vector<128x128xf32>, vector<128x32xf32>, vector<128x32xf32> -> vector<128x32xf32>
    %51 = tpu.reciprocal %49 {approx = true} : vector<128x1xf32> -> vector<128x1xf32>
    %52 = vector.broadcast %51 : vector<128x1xf32> to vector<128x32xf32>
    %53 = arith.mulf %50, %52 : vector<128x32xf32>
    %c0_27 = arith.constant 0 : index
    %c0_28 = arith.constant 0 : index
    %54 = vector.load %arg10[%c0_27, %c0_28] : memref<32x32xf32, #tpu.memory_space<vmem>>, vector<32x32xf32>
    %cst_29 = arith.constant dense<0.000000e+00> : vector<128x32xf32>
    %55 = tpu.matmul %53, %54, %cst_29 {dimension_numbers = #tpu.dot_dimension_numbers<[1], [0], [0], [1], [0, 0, 1, 1], [], []>} : vector<128x32xf32>, vector<32x32xf32>, vector<128x32xf32> -> vector<128x32xf32>
    %56 = vector.extract_strided_slice %24 {offsets = [3, 0], sizes = [1, 32], strides = [1, 1]} : vector<4x32xf32> to vector<1x32xf32>
    %57 = vector.broadcast %56 : vector<1x32xf32> to vector<128x32xf32>
    %58 = arith.addf %55, %57 : vector<128x32xf32>
    %59 = tpu.concatenate %7, %15, %58 in 1 : vector<128x16xf32>, vector<128x32xf32>, vector<128x32xf32> -> vector<128x80xf32>
    %c0_30 = arith.constant 0 : index
    %c0_31 = arith.constant 0 : index
    %60 = vector.load %arg12[%c0_30, %c0_31] : memref<128x80xf32, #tpu.memory_space<vmem>>, vector<128x80xf32>
    tpu.vector_store %arg12[%c0_30, %c0_31], %59 {strides = array<i32>} : memref<128x80xf32, #tpu.memory_space<vmem>>, vector<128x80xf32>,
    return
  }
  func.func @transform_0(%arg0: i32) -> (i32, i32) {
    %c0_i32 = arith.constant 0 : i32
    %c0_i32_0 = arith.constant 0 : i32
    return %arg0, %c0_i32 : i32, i32
  }
  func.func @transform_1(%arg0: i32) -> (i32, i32) {
    %c0_i32 = arith.constant 0 : i32
    %c0_i32_0 = arith.constant 0 : i32
    return %arg0, %c0_i32 : i32, i32
  }
  func.func @transform_2(%arg0: i32) -> (i32, i32) {
    %c0_i32 = arith.constant 0 : i32
    %c0_i32_0 = arith.constant 0 : i32
    return %arg0, %c0_i32 : i32, i32
  }
  func.func @transform_3(%arg0: i32) -> (i32, i32) {
    %c0_i32 = arith.constant 0 : i32
    %c0_i32_0 = arith.constant 0 : i32
    %c0_i32_1 = arith.constant 0 : i32
    return %c0_i32, %c0_i32_0 : i32, i32
  }
  func.func @transform_4(%arg0: i32) -> (i32, i32) {
    %c0_i32 = arith.constant 0 : i32
    %c0_i32_0 = arith.constant 0 : i32
    %c0_i32_1 = arith.constant 0 : i32
    return %c0_i32, %c0_i32_0 : i32, i32
  }
  func.func @transform_5(%arg0: i32) -> (i32, i32) {
    %c0_i32 = arith.constant 0 : i32
    %c0_i32_0 = arith.constant 0 : i32
    %c0_i32_1 = arith.constant 0 : i32
    return %c0_i32, %c0_i32_0 : i32, i32
  }
  func.func @transform_6(%arg0: i32) -> (i32, i32) {
    %c0_i32 = arith.constant 0 : i32
    %c0_i32_0 = arith.constant 0 : i32
    %c0_i32_1 = arith.constant 0 : i32
    return %c0_i32, %c0_i32_0 : i32, i32
  }
  func.func @transform_7(%arg0: i32) -> (i32, i32) {
    %c0_i32 = arith.constant 0 : i32
    %c0_i32_0 = arith.constant 0 : i32
    %c0_i32_1 = arith.constant 0 : i32
    return %c0_i32, %c0_i32_0 : i32, i32
  }
  func.func @transform_8(%arg0: i32) -> (i32, i32) {
    %c0_i32 = arith.constant 0 : i32
    %c0_i32_0 = arith.constant 0 : i32
    %c0_i32_1 = arith.constant 0 : i32
    return %c0_i32, %c0_i32_0 : i32, i32
  }
  func.func @transform_9(%arg0: i32) -> (i32, i32) {
    %c0_i32 = arith.constant 0 : i32
    %c0_i32_0 = arith.constant 0 : i32
    %c0_i32_1 = arith.constant 0 : i32
    return %c0_i32, %c0_i32_0 : i32, i32
  }
  func.func @transform_10(%arg0: i32) -> (i32, i32) {
    %c0_i32 = arith.constant 0 : i32
    %c0_i32_0 = arith.constant 0 : i32
    %c0_i32_1 = arith.constant 0 : i32
    return %c0_i32, %c0_i32_0 : i32, i32
  }
  func.func @transform_11(%arg0: i32) -> (i32, i32) {
    %c0_i32 = arith.constant 0 : i32
    %c0_i32_0 = arith.constant 0 : i32
    return %arg0, %c0_i32 : i32, i32
  }
}

</mosaic_0001>

<bundles_post_ra>
// kernel: voyager_encoder_forward.1
= control target key start
LH: loop header
LB: loop body
LE: loop exit
PB: predicated region body
PF: predicated region fallthrough
CT: control target
= control target key end

     0   :  { %v3415_v2 = vmov 0   ;;  %s4450_s0 = inlined_call_operand.vmem [shape: s32[128,1], index: 0, kind: input, shape index: {}]   ;;  %s4451_s1 = inlined_call_operand.vmem [shape: s32[128,1], index: 1, kind: input, shape index: {}]   ;;  %s4452_s2 = inlined_call_operand.vmem [shape: s32[128,1], index: 2, kind: input, shape index: {}]   ;;  %s4453_s3 = inlined_call_operand.vmem [shape: f32[128,128], index: 3, kind: input, shape index: {}]   ;;  %s4454_s4 = inlined_call_operand.vmem [shape: f32[64,16], index: 4, kind: input, shape index: {}]   ;;  %s4455_s5 = inlined_call_operand.vmem [shape: f32[128,32], index: 5, kind: input, shape index: {}]   ;;  %s4456_s6 = inlined_call_operand.vmem [shape: f32[64,32], index: 6, kind: input, shape index: {}]   ;;  %s4457_s7 = inlined_call_operand.vmem [shape: f32[32,32], index: 7, kind: input, shape index: {}]   ;;  %s4458_s8 = inlined_call_operand.vmem [shape: f32[32,64], index: 8, kind: input, shape index: {}]   ;;  %s4459_s9 = inlined_call_operand.vmem [shape: f32[32,32], index: 9, kind: input, shape index: {}]   ;;  %s4460_s10 = inlined_call_operand.vmem [shape: f32[4,32], index: 10, kind: input, shape index: {}]   ;;  %s4461_s11 = inlined_call_operand.hbm [shape: f32[128,80], index: 11, kind: output, shape index: {}]  }
   0x1   :  { %v51_v0 = vld [vmem:[%s4450_s0 + $0x10] sm:$0xff]  ;;  %v49_v1 = vld [vmem:[%s4450_s0] sm:$0xff]  ;;  %3286 = vset.pattern.permute.xlu1 %v3415_v2  ;;  %3285 = vset.pattern.permute.xlu0 %v3415_v2  ;;  %v52_v3 = vld [vmem:[%s4450_s0 + $0x18] sm:$0xff] }
   0x2   :  { %72 = vperm.xlu1 %3286, %v51_v0   ;;  %66 = vperm.xlu0 %3285, %v49_v1   ;;  %v50_v4 = vld [vmem:[%s4450_s0 + $0x8] sm:$0xff]  ;;  %v53_v6 = vld [vmem:[%s4450_s0 + $0x20] sm:$0xff]  ;;  %v56_v7 = vld [vmem:[%s4450_s0 + $0x38] sm:$0xff] }
   0x3   :  { %v54_v5 = vld [vmem:[%s4450_s0 + $0x28] sm:$0xff]  ;;  %v55_v8 = vld [vmem:[%s4450_s0 + $0x30] sm:$0xff]  ;;  %v57_v10 = vld [vmem:[%s4450_s0 + $0x40] sm:$0xff] }
   0x4   :  { %v58_v9 = vld [vmem:[%s4450_s0 + $0x48] sm:$0xff]  ;;  %v39_v11 = vld [vmem:[%s4454_s4] sm:$0xff]  ;;  %v41_v13 = vld [vmem:[%s4454_s4 + $0x10] sm:$0xff] }
   0x5   :  { %v40_v12 = vld [vmem:[%s4454_s4 + $0x8] sm:$0xff]  ;;  %v42_v15 = vld [vmem:[%s4454_s4 + $0x18] sm:$0xff]  ;;  %v43_v18 = vld [vmem:[%s4454_s4 + $0x20] sm:$0xff] }
   0x6   :  { %75 = vperm.xlu1 %3286, %v52_v3   ;;  %69 = vperm.xlu0 %3285, %v50_v4   ;;  %v3099_v14 = vpack.c.bf16 %v40_v12, %v39_v11  ;;  %v60_v16 = vld [vmem:[%s4450_s0 + $0x58] sm:$0xff]  ;;  %v3103_v17 = vpack.c.bf16 %v42_v15, %v41_v13  ;;  %v44_v19 = vld [vmem:[%s4454_s4 + $0x28] sm:$0xff]  ;;  %v59_v20 = vld [vmem:[%s4450_s0 + $0x50] sm:$0xff] }
   0x7   :  { %v355_v21 = vld [vmem:[%s4455_s5] sm:$0xff]  ;;  %v356_v22 = vld [vmem:[%s4455_s5 + $0x8] sm:$0xff]  ;;  %v357_v24 = vld [vmem:[%s4455_s5 + $0x10] sm:$0xff]  ;;  %v3107_v26 = vpack.c.bf16 %v44_v19, %v43_v18 }
   0x8   :  { %3100 = vmatprep.subr.bf16.mxu0 %v3099_v14  ;;  %v3115_v23 = vpack.c.bf16 %v356_v22, %v355_v21  ;;  %v358_v25 = vld [vmem:[%s4455_s5 + $0x18] sm:$0xff]  ;;  %v45_v27 = vld [vmem:[%s4454_s4 + $0x30] sm:$0xff]  ;;  %v359_v30 = vld [vmem:[%s4455_s5 + $0x20] sm:$0xff] }
   0x9   :  { %3102 = vmatpush3.bf16.msra.mxu0 %v3099_v14  ;;  %v46_v28 = vld [vmem:[%s4454_s4 + $0x38] sm:$0xff]  ;;  %v3119_v29 = vpack.c.bf16 %v358_v25, %v357_v24  ;;  %v360_v31 = vld [vmem:[%s4455_s5 + $0x28] sm:$0xff] }
   0xa   :  { %81 = vperm.xlu1 %3286, %v54_v5   ;;  %78 = vperm.xlu0 %3285, %v53_v6  }
   0xb   :  { %3104 = vmatprep.subr.bf16.mxu0 %v3103_v17 }
   0xe   :  { %87 = vperm.xlu1 %3286, %v56_v7   ;;  %84 = vperm.xlu0 %3285, %v55_v8  }
  0x12   :  { %93 = vperm.xlu1 %3286, %v58_v9   ;;  %90 = vperm.xlu0 %3285, %v57_v10  }
  0x16   :  { %99 = vperm.xlu1 %3286, %v60_v16   ;;  %96 = vperm.xlu0 %3285, %v59_v20  }
  0x17   :  { %16 = vsyncpa [#allocation3], 0  ;;  %v62_v32 = vld [vmem:[%s4450_s0 + $0x68] sm:$0xff]  ;;  %v61_v33 = vld [vmem:[%s4450_s0 + $0x60] sm:$0xff]  ;;  %3116 = vmatprep.subr.bf16.mxu1 %v3115_v23  ;;  %3106 = vmatpush3.bf16.msra.mxu0 %v3103_v17  ;;  %v3111_v34 = vpack.c.bf16 %v46_v28, %v45_v27  ;;  %v3123_v36 = vpack.c.bf16 %v360_v31, %v359_v30  ;;  %v47_v24 = vlaneseq  ;;  %vm161_vm0 = vcmask 523264  }
  0x18   :  { %3118 = vmatpush3.bf16.msra.mxu1 %v3115_v23  ;;  %3108 = vmatprep.subr.bf16.mxu0 %v3107_v26  ;;  %v628_v35 = vld [vmem:[%s4456_s6] sm:$0xff]  ;;  %v629_v37 = vld [vmem:[%s4456_s6 + $0x8] sm:$0xff]  ;;  %v361_v38 = vld [vmem:[%s4455_s5 + $0x30] sm:$0xff]  ;;  %v3416_v28 = vmov 0.0  }
  0x19   :  { %3120 = vmatprep.subr.bf16.mxu1 %v3119_v29  ;;  %v362_v39 = vld [vmem:[%s4455_s5 + $0x38] sm:$0xff]  ;;  %v63_v41 = vld [vmem:[%s4450_s0 + $0x70] sm:$0xff]  ;;  %v3587_v42 = vpack.c.bf16 %v629_v37, %v628_v35  ;;  %v363_v44 = vld [vmem:[%s4455_s5 + $0x40] sm:$0xff]  ;;  %v3712_v25 = vand.u32 127, %v47_v24 }
  0x1a   :  { %105 = vperm.xlu1 %3286, %v62_v32   ;;  %102 = vperm.xlu0 %3285, %v61_v33   ;;  %v64_v40 = vld [vmem:[%s4450_s0 + $0x78] sm:$0xff]  ;;  %v3127_v43 = vpack.c.bf16 %v362_v39, %v361_v38  ;;  %v364_v45 = vld [vmem:[%s4455_s5 + $0x48] sm:$0xff]  ;;  %v636_v47 = vld [vmem:[%s4452_s2] sm:$0xff]  ;;  %s3422_s0 = smov [#allocation2]  }
  0x1b   :  { %3110 = vmatpush3.bf16.msra.mxu0 %v3107_v26  ;;  %v637_v46 = vld [vmem:[%s4452_s2 + $0x8] sm:$0xff]  ;;  %v3131_v48 = vpack.c.bf16 %v364_v45, %v363_v44  ;;  %v365_v49 = vld [vmem:[%s4455_s5 + $0x50] sm:$0xff]  ;;  %v366_v50 = vld [vmem:[%s4455_s5 + $0x58] sm:$0xff]  ;;  %s2364_s14 = sshll.u32 %s3422_s0, 4  ;;  %s2365_s14 = int_to_ptr.vmem [resolvable:$true] %s2364_s14 }
  0x1c   :  { %3122 = vmatpush3.bf16.msra.mxu1 %v3119_v29  ;;  %3112 = vmatprep.subr.bf16.mxu0 %v3111_v34  ;;  %v639_v51 = vld [vmem:[%s4452_s2 + $0x18] sm:$0xff]  ;;  %v638_v52 = vld [vmem:[%s4452_s2 + $0x10] sm:$0xff]  ;;  %v3135_v53 = vpack.c.bf16 %v366_v50, %v365_v49  ;;  %v367_v54 = vld [vmem:[%s4455_s5 + $0x60] sm:$0xff]  ;;  %s3391_s15 = scalar_lea.vmem %s2365_s14, 2048  ;;  %p3396_p1 = scmp.lt.s32.totalorder %s2365_s14, %s2365_s14 }
  0x1d   :  { %3124 = vmatprep.subr.bf16.mxu1 %v3123_v36  ;;  %v368_v55 = vld [vmem:[%s4455_s5 + $0x68] sm:$0xff]  ;;  %v371_v56 = vld [vmem:[%s4451_s1] sm:$0xff]  ;;  %v369_v59 = vld [vmem:[%s4455_s5 + $0x70] sm:$0xff]  ;;  %p3392_p0 = scmp.ne.s32.totalorder %s2365_s14, %s3391_s15  ;;  %p3397_p2 = scmp.lt.s32.totalorder %s3391_s15, %s3391_s15 }
  0x1e   :  { %111 = vperm.xlu1 %3286, %v64_v40   ;;  %108 = vperm.xlu0 %3285, %v63_v41   ;;  %v640_v57 = vld [vmem:[%s4452_s2 + $0x20] sm:$0xff]  ;;  %v3139_v58 = vpack.c.bf16 %v368_v55, %v367_v54  ;;  %v370_v60 = vld [vmem:[%s4455_s5 + $0x78] sm:$0xff]  ;;  %v372_v61 = vld [vmem:[%s4451_s1 + $0x8] sm:$0xff] }
  0x1f   :  { %3114 = vmatpush3.bf16.msra.mxu0 %v3111_v34  ;;  %v641_v62 = vld [vmem:[%s4452_s2 + $0x28] sm:$0xff]  ;;  %v3143_v63 = vpack.c.bf16 %v370_v60, %v369_v59  ;;  %v374_v0 = vld [vmem:[%s4451_s1 + $0x18] sm:$0xff]  ;;  %v373_v1 = vld [vmem:[%s4451_s1 + $0x10] sm:$0xff]  ;;  %p3398_p3 = por %p3397_p2, %p3396_p1 }
  0x20   :  { %3126 = vmatpush3.bf16.msra.mxu1 %v3123_v36  ;;  %3148 = vmatprep.subr.bf16.mxu0 %v3587_v42  ;;  %v375_v2 = vld [vmem:[%s4451_s1 + $0x20] sm:$0xff]  ;;  %v642_v3 = vld [vmem:[%s4452_s2 + $0x30] sm:$0xff]  ;;  %v376_v4 = vld [vmem:[%s4451_s1 + $0x28] sm:$0xff] }
  0x21   :  { %3128 = vmatprep.subr.bf16.mxu1 %v3127_v43  ;;  %v643_v5 = vld [vmem:[%s4452_s2 + $0x38] sm:$0xff]  ;;  %v377_v7 = vld [vmem:[%s4451_s1 + $0x30] sm:$0xff]  ;;  %v379_v8 = vld [vmem:[%s4451_s1 + $0x40] sm:$0xff]  ;;  %p3399_p4 = pnand %p3398_p3, %p3392_p0 }
  0x22   :  { %656 = vperm.xlu1 %3286, %v637_v46   ;;  %653 = vperm.xlu0 %3285, %v636_v47   ;;  %v378_v6 = vld [vmem:[%s4451_s1 + $0x38] sm:$0xff]  ;;  %v644_v9 = vld [vmem:[%s4452_s2 + $0x40] sm:$0xff]  ;;  %v380_v10 = vld [vmem:[%s4451_s1 + $0x48] sm:$0xff] }
  0x23   :  { %v645_v11 = vld [vmem:[%s4452_s2 + $0x48] sm:$0xff]  ;;  %v382_v12 = vld [vmem:[%s4451_s1 + $0x58] sm:$0xff]  ;;  %v381_v13 = vld [vmem:[%s4451_s1 + $0x50] sm:$0xff] }
  0x24   :  { %3130 = vmatpush3.bf16.msra.mxu1 %v3127_v43  ;;  %v383_v14 = vld [vmem:[%s4451_s1 + $0x60] sm:$0xff]  ;;  %v646_v15 = vld [vmem:[%s4452_s2 + $0x50] sm:$0xff]  ;;  %v384_v16 = vld [vmem:[%s4451_s1 + $0x68] sm:$0xff] }
  0x25   :  { %3132 = vmatprep.subr.bf16.mxu1 %v3131_v48  ;;  %v647_v17 = vld [vmem:[%s4452_s2 + $0x58] sm:$0xff]  ;;  %v385_v19 = vld [vmem:[%s4451_s1 + $0x70] sm:$0xff]  ;;  %v649_v20 = vld [vmem:[%s4452_s2 + $0x68] sm:$0xff] }
  0x26   :  { %662 = vperm.xlu1 %3286, %v639_v51   ;;  %659 = vperm.xlu0 %3285, %v638_v52   ;;  %v386_v18 = vld [vmem:[%s4451_s1 + $0x78] sm:$0xff]  ;;  %v648_v21 = vld [vmem:[%s4452_s2 + $0x60] sm:$0xff]  ;;  %v650_v23 = vld [vmem:[%s4452_s2 + $0x70] sm:$0xff] }
  0x27   :  { %v651_v22 = vld [vmem:[%s4452_s2 + $0x78] sm:$0xff]  ;;  %v630_v30 = vld [vmem:[%s4456_s6 + $0x10] sm:$0xff]  ;;  %v632_v36 = vld [vmem:[%s4456_s6 + $0x20] sm:$0xff] }
  0x28   :  { %3134 = vmatpush3.bf16.msra.mxu1 %v3131_v48  ;;  %v631_v31 = vld [vmem:[%s4456_s6 + $0x18] sm:$0xff]  ;;  %v633_v37 = vld [vmem:[%s4456_s6 + $0x28] sm:$0xff]  ;;  %v634_v45 = vld [vmem:[%s4456_s6 + $0x30] sm:$0xff] }
  0x29   :  { %3136 = vmatprep.subr.bf16.mxu1 %v3135_v53  ;;  %v3725_v34 = vpack.c.bf16 %v631_v31, %v630_v30  ;;  %v3741_v41 = vpack.c.bf16 %v633_v37, %v632_v36  ;;  %v635_v46 = vld [vmem:[%s4456_s6 + $0x38] sm:$0xff] }
  0x2a   :  { %388 = vperm.xlu1 %3286, %v371_v56   ;;  %665 = vperm.xlu0 %3285, %v640_v57   ;;  %v3757_v49 = vpack.c.bf16 %v635_v46, %v634_v45 }
  0x2c   :  { %3138 = vmatpush3.bf16.msra.mxu1 %v3135_v53 }
  0x2d   :  { %3140 = vmatprep.subr.bf16.mxu1 %v3139_v58 }
  0x2e   :  { %391 = vperm.xlu1 %3286, %v372_v61   ;;  %668 = vperm.xlu0 %3285, %v641_v62  }
  0x30   :  { %3142 = vmatpush3.bf16.msra.mxu1 %v3139_v58 }
  0x31   :  { %3144 = vmatprep.subr.bf16.mxu1 %v3143_v63 }
  0x32   :  { %397 = vperm.xlu1 %3286, %v374_v0   ;;  %394 = vperm.xlu0 %3285, %v373_v1  }
  0x34   :  { %3146 = vmatpush3.bf16.msra.mxu1 %v3143_v63 }
  0x35   :  { %3267 = vmatprep.subr.bf16.mxu1 %v3587_v42 }
  0x36   :  { %400 = vperm.xlu1 %3286, %v375_v2   ;;  %671 = vperm.xlu0 %3285, %v642_v3  }
  0x3a   :  { %403 = vperm.xlu1 %3286, %v376_v4   ;;  %674 = vperm.xlu0 %3285, %v643_v5  }
  0x3e   :  { %409 = vperm.xlu1 %3286, %v378_v6   ;;  %406 = vperm.xlu0 %3285, %v377_v7  }
  0x42   :  { %412 = vperm.xlu1 %3286, %v379_v8   ;;  %677 = vperm.xlu0 %3285, %v644_v9  }
  0x46   :  { %415 = vperm.xlu1 %3286, %v380_v10   ;;  %680 = vperm.xlu0 %3285, %v645_v11  }
  0x4a   :  { %421 = vperm.xlu1 %3286, %v382_v12   ;;  %418 = vperm.xlu0 %3285, %v381_v13  }
  0x4e   :  { %424 = vperm.xlu1 %3286, %v383_v14   ;;  %683 = vperm.xlu0 %3285, %v646_v15  }
  0x52   :  { %427 = vperm.xlu1 %3286, %v384_v16   ;;  %686 = vperm.xlu0 %3285, %v647_v17   ;;  %v3417_v16 = vmov 1.0  }
  0x56   :  { %433 = vperm.xlu1 %3286, %v386_v18   ;;  %430 = vperm.xlu0 %3285, %v385_v19  }
  0x5a   :  { %692 = vperm.xlu1 %3286, %v649_v20   ;;  %689 = vperm.xlu0 %3285, %v648_v21  }
  0x5e   :  { %698 = vperm.xlu1 %3286, %v651_v22   ;;  %695 = vperm.xlu0 %3285, %v650_v23  }
  0x81   :  { %v73_v26 = vpop.permute.xlu1 %72  ;;  %v67_v27 = vpop.permute.xlu0 %66 }
  0x82   :  { %vm113_vm1 = vcmp.eq.s32.totalorder %v3712_v25, %v67_v27  ;;  %vm115_vm2 = vcmp.eq.s32.totalorder %v3712_v25, %v73_v26 }
  0x83   :  { %v2375_v29 = vsel %vm113_vm1, 1.0, %v3416_v28  ;;  %v2377_v38 = vsel %vm115_vm2, 1.0, %v3416_v28 }
  0x84   :  { %2771 = vmatprep.mubr.msk.f32.mxu0 %vm161_vm0, %v2375_v29 }
  0x85   :  { %v76_v32 = vpop.permute.xlu1 %75  ;;  %v70_v33 = vpop.permute.xlu0 %69 }
  0x86   :  { %vm114_vm3 = vcmp.eq.s32.totalorder %v3712_v25, %v70_v33  ;;  %vm116_vm4 = vcmp.eq.s32.totalorder %v3712_v25, %v76_v32 }
  0x87   :  { %v2376_v35 = vsel %vm114_vm3, 1.0, %v3416_v28  ;;  %v2378_v43 = vsel %vm116_vm4, 1.0, %v3416_v28 }
  0x88   :  { %2772 = vmatmul.mubr.msk.f32.vlgmr.msra.gmra.mrb[0].mxu0 %vm161_vm0, %v2376_v35 }
  0x89   :  { %v82_v39 = vpop.permute.xlu1 %81  ;;  %v79_v40 = vpop.permute.xlu0 %78  ;;  %2774 = vmatprep.mubr.msk.f32.mxu0 %vm161_vm0, %v2377_v38  ;;  %3150 = vmatpush3.bf16.msra.mxu0 %v3587_v42 }
  0x8a   :  { %vm117_vm5 = vcmp.eq.s32.totalorder %v3712_v25, %v79_v40  ;;  %3152 = vmatprep.subr.bf16.mxu0 %v3725_v34  ;;  %vm118_vm6 = vcmp.eq.s32.totalorder %v3712_v25, %v82_v39 }
  0x8b   :  { %v2379_v44 = vsel %vm117_vm5, 1.0, %v3416_v28  ;;  %v2380_v50 = vsel %vm118_vm6, 1.0, %v3416_v28 }
  0x8c   :  { %2775 = vmatmul.mubr.msk.f32.gmra.mrb[2].mxu0 %vm161_vm0, %v2378_v43 }
  0x8d   :  { %v88_v47 = vpop.permute.xlu1 %87  ;;  %v85_v48 = vpop.permute.xlu0 %84  ;;  %2777 = vmatprep.mubr.msk.f32.mxu0 %vm161_vm0, %v2379_v44  ;;  %3154 = vmatpush3.bf16.msra.mxu0 %v3725_v34 }
  0x8e   :  { %vm119_vm7 = vcmp.eq.s32.totalorder %v3712_v25, %v85_v48  ;;  %3156 = vmatprep.subr.bf16.mxu0 %v3741_v41  ;;  %vm120_vm8 = vcmp.eq.s32.totalorder %v3712_v25, %v88_v47 }
  0x8f   :  { %v2381_v51 = vsel %vm119_vm7, 1.0, %v3416_v28  ;;  %v2382_v54 = vsel %vm120_vm8, 1.0, %v3416_v28 }
  0x90   :  { %2778 = vmatmul.mubr.msk.f32.gmra.mrb[4].mxu0 %vm161_vm0, %v2380_v50 }
  0x91   :  { %v94_v52 = vpop.permute.xlu1 %93  ;;  %v91_v53 = vpop.permute.xlu0 %90  ;;  %2780 = vmatprep.mubr.msk.f32.mxu0 %vm161_vm0, %v2381_v51  ;;  %3158 = vmatpush3.bf16.msra.mxu0 %v3741_v41 }
  0x92   :  { %vm121_vm9 = vcmp.eq.s32.totalorder %v3712_v25, %v91_v53  ;;  %3160 = vmatprep.subr.bf16.mxu0 %v3757_v49  ;;  %vm122_vm10 = vcmp.eq.s32.totalorder %v3712_v25, %v94_v52 }
  0x93   :  { %v2383_v55 = vsel %vm121_vm9, 1.0, %v3416_v28  ;;  %v2384_v58 = vsel %vm122_vm10, 1.0, %v3416_v28 }
  0x94   :  { %2781 = vmatmul.mubr.msk.f32.gmra.mrb[6].mxu0 %vm161_vm0, %v2382_v54 }
  0x95   :  { %v100_v56 = vpop.permute.xlu1 %99  ;;  %v97_v57 = vpop.permute.xlu0 %96  ;;  %2783 = vmatprep.mubr.msk.f32.mxu0 %vm161_vm0, %v2383_v55  ;;  %3162 = vmatpush3.bf16.msra.mxu0 %v3757_v49 }
  0x96   :  { %vm123_vm11 = vcmp.eq.s32.totalorder %v3712_v25, %v97_v57  ;;  %vm124_vm12 = vcmp.eq.s32.totalorder %v3712_v25, %v100_v56  ;;  %v1144_v57 = vld [vmem:[%s4458_s8] sm:$0xff] }
  0x97   :  { %v2385_v59 = vsel %vm123_vm11, 1.0, %v3416_v28  ;;  %v2386_v62 = vsel %vm124_vm12, 1.0, %v3416_v28 }
  0x98   :  { %2784 = vmatmul.mubr.msk.f32.gmra.mrb[8].mxu0 %vm161_vm0, %v2384_v58  ;;  %v1145_v58 = vld [vmem:[%s4458_s8 + $0x8] sm:$0xff] }
  0x99   :  { %v106_v60 = vpop.permute.xlu1 %105  ;;  %v103_v61 = vpop.permute.xlu0 %102  ;;  %2786 = vmatprep.mubr.msk.f32.mxu0 %vm161_vm0, %v2385_v59  ;;  %v3171_v59 = vpack.c.bf16 %v1145_v58, %v1144_v57 }
  0x9a   :  { %vm125_vm13 = vcmp.eq.s32.totalorder %v3712_v25, %v103_v61  ;;  %vm126_vm14 = vcmp.eq.s32.totalorder %v3712_v25, %v106_v60  ;;  %v942_v61 = vld [vmem:[%s4457_s7] sm:$0xff] }
  0x9b   :  { %v2387_v63 = vsel %vm125_vm13, 1.0, %v3416_v28  ;;  %v2388_v2 = vsel %vm126_vm14, 1.0, %v3416_v28  ;;  %3172 = vmatprep.subr.bf16.mxu0 %v3171_v59 }
  0x9c   :  { %2787 = vmatmul.mubr.msk.f32.gmra.mrb[10].mxu0 %vm161_vm0, %v2386_v62  ;;  %v943_v62 = vld [vmem:[%s4457_s7 + $0x8] sm:$0xff] }
  0x9d   :  { %v112_v0 = vpop.permute.xlu1 %111  ;;  %v109_v1 = vpop.permute.xlu0 %108  ;;  %2789 = vmatprep.mubr.msk.f32.mxu0 %vm161_vm0, %v2387_v63  ;;  %v3163_v63 = vpack.c.bf16 %v943_v62, %v942_v61 }
  0x9e   :  { %vm127_vm15 = vcmp.eq.s32.totalorder %v3712_v25, %v109_v1  ;;  %vm128_vm1 = vcmp.eq.s32.totalorder %v3712_v25, %v112_v0  ;;  %v944_v0 = vld [vmem:[%s4457_s7 + $0x10] sm:$0xff]  ;;  %v945_v1 = vld [vmem:[%s4457_s7 + $0x18] sm:$0xff]  ;;  %s3418_s7 = smov 32  }
  0x9f   :  { %v2389_v3 = vsel %vm127_vm15, 1.0, %v3416_v28  ;;  %v2390_v6 = vsel %vm128_vm1, 1.0, %v3416_v28 }
  0xa0   :  { %2790 = vmatmul.mubr.msk.f32.gmra.mrb[12].mxu0 %vm161_vm0, %v2388_v2  ;;  %v3167_v2 = vpack.c.bf16 %v945_v1, %v944_v0 }
  0xa1   :  { %v657_v4 = vpop.permute.xlu1 %656  ;;  %v654_v5 = vpop.permute.xlu0 %653  ;;  %2792 = vmatprep.mubr.msk.f32.mxu0 %vm161_vm0, %v2389_v3  ;;  %v947_v3 = vshrl.u32 %v47_v24, 7 }
  0xa2   :  { %vm700_vm2 = vcmp.eq.s32.totalorder %v3712_v25, %v654_v5  ;;  %vm701_vm3 = vcmp.eq.s32.totalorder %v3712_v25, %v657_v4  ;;  %v941_v4 = vld [vmem:[%s4460_s10] sm:$0xf]  ;;  %s3419_s10 = smov 96  }
  0xa3   :  { %v2439_v7 = vsel %vm700_vm2, 1.0, %v3416_v28  ;;  %v2440_v10 = vsel %vm701_vm3, 1.0, %v3416_v28  ;;  %v1363_v5 = vsub.s32 2, %v947_v3 }
  0xa4   :  { %2793 = vmatmul.mubr.msk.f32.gmra.mrb[14].mxu0 %vm161_vm0, %v2390_v6  ;;  %v2001_v6 = vsub.s32 3, %v947_v3 }
  0xa5   :  { %v663_v8 = vpop.permute.xlu1 %662  ;;  %v660_v9 = vpop.permute.xlu0 %659  ;;  %2867 = vmatprep.mubr.msk.f32.mxu0 %vm161_vm0, %v2439_v7  ;;  %v948_v7 = vsub.s32 0, %v947_v3 }
  0xa6   :  { %vm702_vm4 = vcmp.eq.s32.totalorder %v3712_v25, %v660_v9  ;;  %vm703_vm5 = vcmp.eq.s32.totalorder %v3712_v25, %v663_v8  ;;  %v1343_v8 = vsub.s32 1, %v947_v3  ;;  %v1364_v9 = vrot.slane %v941_v4, %v1363_v5 }
  0xa7   :  { %v2441_v11 = vsel %vm702_vm4, 1.0, %v3416_v28  ;;  %v2442_v14 = vsel %vm703_vm5, 1.0, %v3416_v28 }
  0xa8   :  { %2868 = vmatmul.mubr.msk.f32.vlgmr.msra.gmra.mrb[16].mxu0 %vm161_vm0, %v2440_v10  ;;  %v3908_v10 = vrot.slane %v941_v4, %v2001_v6  ;;  %1366 = vrot.lane.b32.xlu0 %v1364_v9, %s3418_s7 }
  0xa9   :  { %v389_v12 = vpop.permute.xlu1 %388  ;;  %v666_v13 = vpop.permute.xlu0 %665  ;;  %2870 = vmatprep.mubr.msk.f32.mxu0 %vm161_vm0, %v2441_v11  ;;  %3174 = vmatpush3.bf16.msra.mxu0 %v3171_v59  ;;  %v3910_v11 = vrot.slane %v941_v4, %v948_v7 }
  0xaa   :  { %vm704_vm6 = vcmp.eq.s32.totalorder %v3712_v25, %v666_v13  ;;  %vm435_vm7 = vcmp.eq.s32.totalorder %v3712_v25, %v389_v12  ;;  %v3912_v12 = vrot.slane %v941_v4, %v1343_v8 }
  0xab   :  { %v2443_v15 = vsel %vm704_vm6, 1.0, %v3416_v28  ;;  %2827 = vmatprep.mubr.msk.f32.mxu1 %vm435_vm7, %v3417_v16 }
  0xac   :  { %2871 = vmatmul.mubr.msk.f32.gmra.mrb[18].mxu0 %vm161_vm0, %v2442_v14 }
  0xad   :  { %v392_v17 = vpop.permute.xlu1 %391  ;;  %v669_v18 = vpop.permute.xlu0 %668  ;;  %2873 = vmatprep.mubr.msk.f32.mxu0 %vm161_vm0, %v2443_v15 }
  0xae   :  { %vm436_vm8 = vcmp.eq.s32.totalorder %v3712_v25, %v392_v17  ;;  %vm705_vm9 = vcmp.eq.s32.totalorder %v3712_v25, %v669_v18 }
  0xaf   :  { %v2444_v19 = vsel %vm705_vm9, 1.0, %v3416_v28  ;;  %2828 = vmatmul.mubr.msk.f32.vlgmr.msra.gmra.mrb[0].mxu1 %vm436_vm8, %v3417_v16 }
  0xb0   :  { %2874 = vmatmul.mubr.msk.f32.gmra.mrb[20].mxu0 %vm161_vm0, %v2444_v19  ;;  %3271 = vmatpush3.bf16.msra.mxu1 %v3587_v42 }
  0xb1   :  { %v398_v20 = vpop.permute.xlu1 %397  ;;  %v395_v21 = vpop.permute.xlu0 %394  ;;  %3268 = vmatprep.subr.bf16.mxu1 %v3725_v34 }
  0xb2   :  { %vm438_vm10 = vcmp.eq.s32.totalorder %v3712_v25, %v398_v20  ;;  %vm437_vm11 = vcmp.eq.s32.totalorder %v3712_v25, %v395_v21 }
  0xb3   :  { %2830 = vmatprep.mubr.msk.f32.mxu1 %vm437_vm11, %v3417_v16 }
  0xb4   :  { %2831 = vmatmul.mubr.msk.f32.gmra.mrb[2].mxu1 %vm438_vm10, %v3417_v16 }
  0xb5   :  { %v401_v22 = vpop.permute.xlu1 %400  ;;  %v672_v23 = vpop.permute.xlu0 %671  ;;  %3272 = vmatpush3.bf16.msra.mxu1 %v3725_v34 }
  0xb6   :  { %vm439_vm12 = vcmp.eq.s32.totalorder %v3712_v25, %v401_v22  ;;  %vm706_vm13 = vcmp.eq.s32.totalorder %v3712_v25, %v672_v23  ;;  %3269 = vmatprep.subr.bf16.mxu1 %v3741_v41 }
  0xb7   :  { %v2445_v42 = vsel %vm706_vm13, 1.0, %v3416_v28  ;;  %2833 = vmatprep.mubr.msk.f32.mxu1 %vm439_vm12, %v3417_v16 }
  0xb8   :  { %2876 = vmatprep.mubr.msk.f32.mxu0 %vm161_vm0, %v2445_v42 }
  0xb9   :  { %v404_v26 = vpop.permute.xlu1 %403  ;;  %v675_v27 = vpop.permute.xlu0 %674  ;;  %3273 = vmatpush3.bf16.msra.mxu1 %v3741_v41 }
  0xba   :  { %vm440_vm14 = vcmp.eq.s32.totalorder %v3712_v25, %v404_v26  ;;  %vm707_vm15 = vcmp.eq.s32.totalorder %v3712_v25, %v675_v27  ;;  %3270 = vmatprep.subr.bf16.mxu1 %v3757_v49 }
  0xbb   :  { %v2446_v29 = vsel %vm707_vm15, 1.0, %v3416_v28  ;;  %2834 = vmatmul.mubr.msk.f32.gmra.mrb[4].mxu1 %vm440_vm14, %v3417_v16 }
  0xbc   :  { %2877 = vmatmul.mubr.msk.f32.gmra.mrb[22].mxu0 %vm161_vm0, %v2446_v29 }
  0xbd   :  { %v410_v30 = vpop.permute.xlu1 %409  ;;  %v407_v31 = vpop.permute.xlu0 %406  ;;  %3274 = vmatpush3.bf16.msra.mxu1 %v3757_v49 }
  0xbe   :  { %vm442_vm1 = vcmp.eq.s32.totalorder %v3712_v25, %v410_v30  ;;  %vm441_vm2 = vcmp.eq.s32.totalorder %v3712_v25, %v407_v31  ;;  %3164 = vmatprep.subr.bf16.mxu1 %v3163_v63 }
  0xbf   :  { %2836 = vmatprep.mubr.msk.f32.mxu1 %vm441_vm2, %v3417_v16 }
  0xc0   :  { %2837 = vmatmul.mubr.msk.f32.gmra.mrb[6].mxu1 %vm442_vm1, %v3417_v16 }
  0xc1   :  { %v413_v32 = vpop.permute.xlu1 %412  ;;  %v678_v33 = vpop.permute.xlu0 %677 }
  0xc2   :  { %vm443_vm3 = vcmp.eq.s32.totalorder %v3712_v25, %v413_v32  ;;  %vm708_vm4 = vcmp.eq.s32.totalorder %v3712_v25, %v678_v33 }
  0xc3   :  { %v2447_v34 = vsel %vm708_vm4, 1.0, %v3416_v28  ;;  %2839 = vmatprep.mubr.msk.f32.mxu1 %vm443_vm3, %v3417_v16 }
  0xc4   :  { %2879 = vmatprep.mubr.msk.f32.mxu0 %vm161_vm0, %v2447_v34 }
  0xc5   :  { %v416_v35 = vpop.permute.xlu1 %415  ;;  %v681_v36 = vpop.permute.xlu0 %680 }
  0xc6   :  { %vm444_vm5 = vcmp.eq.s32.totalorder %v3712_v25, %v416_v35  ;;  %vm709_vm6 = vcmp.eq.s32.totalorder %v3712_v25, %v681_v36 }
  0xc7   :  { %v2448_v37 = vsel %vm709_vm6, 1.0, %v3416_v28  ;;  %2840 = vmatmul.mubr.msk.f32.gmra.mrb[8].mxu1 %vm444_vm5, %v3417_v16  ;;  %vm2308_vm5 = vcmask 130048   ;;  %vm2325_vm6 = vcmask 392192  }
  0xc8   :  { %2880 = vmatmul.mubr.msk.f32.gmra.mrb[24].mxu0 %vm161_vm0, %v2448_v37 }
  0xc9   :  { %v422_v38 = vpop.permute.xlu1 %421  ;;  %v419_v39 = vpop.permute.xlu0 %418 }
  0xca   :  { %vm446_vm7 = vcmp.eq.s32.totalorder %v3712_v25, %v422_v38  ;;  %vm445_vm8 = vcmp.eq.s32.totalorder %v3712_v25, %v419_v39 }
  0xcb   :  { %2842 = vmatprep.mubr.msk.f32.mxu1 %vm445_vm8, %v3417_v16 }
  0xcc   :  { %2843 = vmatmul.mubr.msk.f32.gmra.mrb[10].mxu1 %vm446_vm7, %v3417_v16  ;;  %vm2342_vm7 = vcmask 654336  }
  0xcd   :  { %v425_v40 = vpop.permute.xlu1 %424  ;;  %v684_v41 = vpop.permute.xlu0 %683 }
  0xce   :  { %vm447_vm9 = vcmp.eq.s32.totalorder %v3712_v25, %v425_v40  ;;  %vm710_vm10 = vcmp.eq.s32.totalorder %v3712_v25, %v684_v41 }
  0xcf   :  { %v2449_v43 = vsel %vm710_vm10, 1.0, %v3416_v28  ;;  %2845 = vmatprep.mubr.msk.f32.mxu1 %vm447_vm9, %v3417_v16 }
  0xd0   :  { %2882 = vmatprep.mubr.msk.f32.mxu0 %vm161_vm0, %v2449_v43 }
  0xd1   :  { %v428_v44 = vpop.permute.xlu1 %427  ;;  %v687_v45 = vpop.permute.xlu0 %686 }
  0xd2   :  { %vm448_vm11 = vcmp.eq.s32.totalorder %v3712_v25, %v428_v44  ;;  %vm711_vm12 = vcmp.eq.s32.totalorder %v3712_v25, %v687_v45 }
  0xd3   :  { %v2450_v46 = vsel %vm711_vm12, 1.0, %v3416_v28  ;;  %2846 = vmatmul.mubr.msk.f32.gmra.mrb[12].mxu1 %vm448_vm11, %v3417_v16 }
  0xd4   :  { %2883 = vmatmul.mubr.msk.f32.gmra.mrb[26].mxu0 %vm161_vm0, %v2450_v46 }
  0xd5   :  { %v434_v47 = vpop.permute.xlu1 %433  ;;  %v431_v48 = vpop.permute.xlu0 %430 }
  0xd6   :  { %vm450_vm13 = vcmp.eq.s32.totalorder %v3712_v25, %v434_v47  ;;  %vm449_vm14 = vcmp.eq.s32.totalorder %v3712_v25, %v431_v48 }
  0xd7   :  { %2848 = vmatprep.mubr.msk.f32.mxu1 %vm449_vm14, %v3417_v16 }
  0xd8   :  { %2849 = vmatmul.mubr.msk.f32.gmra.mrb[14].mxu1 %vm450_vm13, %v3417_v16 }
  0xd9   :  { %v693_v49 = vpop.permute.xlu1 %692  ;;  %v690_v50 = vpop.permute.xlu0 %689 }
  0xda   :  { %vm713_vm15 = vcmp.eq.s32.totalorder %v3712_v25, %v693_v49  ;;  %vm712_vm1 = vcmp.eq.s32.totalorder %v3712_v25, %v690_v50 }
  0xdb   :  { %v2452_v51 = vsel %vm713_vm15, 1.0, %v3416_v28  ;;  %v2451_v52 = vsel %vm712_vm1, 1.0, %v3416_v28 }
  0xdc   :  { %2885 = vmatprep.mubr.msk.f32.mxu1 %vm161_vm0, %v2451_v52 }
  0xdd   :  { %v699_v53 = vpop.permute.xlu1 %698  ;;  %v696_v54 = vpop.permute.xlu0 %695  ;;  %2886 = vmatmul.mubr.msk.f32.vlgmr.msra.gmra.mrb[16].mxu1 %vm161_vm0, %v2452_v51 }
  0xde   :  { %vm715_vm2 = vcmp.eq.s32.totalorder %v3712_v25, %v699_v53  ;;  %vm714_vm3 = vcmp.eq.s32.totalorder %v3712_v25, %v696_v54  ;;  %v1146_v25 = vld [vmem:[%s4458_s8 + $0x10] sm:$0xff]  ;;  %3166 = vmatpush3.bf16.msra.mxu1 %v3163_v63 }
  0xdf   :  { %v2454_v55 = vsel %vm715_vm2, 1.0, %v3416_v28  ;;  %v2453_v56 = vsel %vm714_vm3, 1.0, %v3416_v28  ;;  %v1147_v28 = vld [vmem:[%s4458_s8 + $0x18] sm:$0xff]  ;;  %3168 = vmatprep.subr.bf16.mxu1 %v3167_v2 }
  0xe0   :  { %2888 = vmatprep.mubr.msk.f32.mxu1 %vm161_vm0, %v2453_v56  ;;  %v3175_v60 = vpack.c.bf16 %v1147_v28, %v1146_v25 }
  0xe1   :  { %2889 = vmatmul.mubr.msk.f32.gmra.mrb[18].mxu1 %vm161_vm0, %v2454_v55  ;;  %vm950_vm0 = vcmask 261120  }
  0xe2   :  { %3176 = vmatprep.subr.bf16.mxu0 %v3175_v60  ;;  %3170 = vmatpush3.bf16.msra.mxu1 %v3167_v2  ;;  %vm4034_vm4 = vmpackc.low %vm950_vm0, %vm950_vm0 }
  0xe3   :  { %3178 = vmatpush3.bf16.msra.mxu0 %v3175_v60 }
 0x11a   :  { %v4026_v61 = vpop.permute.xlu0 %1366 }
 0x15b   :  { %v3914_v13 = vpop.f32.mrb[0].mxu0 }
 0x15c   :  { %v3916_v24 = vpop.f32.mrb[1].mxu0 }
 0x15f   :  { %v3918_v14 = vpop.f32.mrb[2].mxu0 }
 0x160   :  { %v3920_v15 = vpop.f32.mrb[3].mxu0 }
 0x163   :  { %v3922_v16 = vpop.f32.mrb[4].mxu0 }
 0x164   :  { %v3924_v17 = vpop.f32.mrb[5].mxu0 }
 0x167   :  { %v3926_v18 = vpop.f32.mrb[6].mxu0 }
 0x168   :  { %v3928_v19 = vpop.f32.mrb[7].mxu0 }
 0x16b   :  { %v3930_v20 = vpop.f32.mrb[8].mxu0 }
 0x16c   :  { %v3932_v21 = vpop.f32.mrb[9].mxu0 }
 0x16f   :  { %v3934_v22 = vpop.f32.mrb[10].mxu0 }
 0x170   :  { %v3936_v23 = vpop.f32.mrb[11].mxu0 }
 0x173   :  { %v3938_v42 = vpop.f32.mrb[12].mxu0 }
 0x174   :  { %v3940_v26 = vpop.f32.mrb[13].mxu0 }
 0x177   :  { %v3942_v27 = vpop.f32.mrb[14].mxu0 }
 0x178   :  { %v3944_v29 = vpop.f32.mrb[15].mxu0 }
 0x17b   :  { %v2869_v30 = vpop.f32.mrb[16].mxu0 }
 0x17c   :  { %v862_v31 = vpop.f32.mrb[17].mxu0 }
 0x17d   :  { %2931 = vmatprep.mubr.msk.f32.mxu0 %vm950_vm0, %v862_v31 }
 0x17e   :  { %2932 = vmatmul.mubr.msk.f32.vlgmr.msra.gmra.mrb[28].mxu0 %vm950_vm0, %v2869_v30 }
 0x17f   :  { %v2872_v32 = vpop.f32.mrb[18].mxu0 }
 0x180   :  { %v872_v33 = vpop.f32.mrb[19].mxu0 }
 0x181   :  { %2934 = vmatprep.mubr.msk.f32.mxu0 %vm950_vm0, %v872_v33 }
 0x182   :  { %v3949_v34 = vpop.f32.mrb[0].mxu1  ;;  %2935 = vmatmul.mubr.msk.f32.gmra.mrb[30].mxu0 %vm950_vm0, %v2872_v32 }
 0x183   :  { %v3952_v35 = vpop.f32.mrb[1].mxu1  ;;  %v2875_v36 = vpop.f32.mrb[20].mxu0 }
 0x184   :  { %v882_v37 = vpop.f32.mrb[21].mxu0  ;;  %2899 = vmatprep.mubr.msk.f32.mxu1 %vm950_vm0, %v3952_v35 }
 0x185   :  { %2900 = vmatmul.mubr.msk.f32.vlgmr.msra.gmra.mrb[20].mxu1 %vm950_vm0, %v3949_v34  ;;  %2937 = vmatprep.mubr.msk.f32.mxu0 %vm950_vm0, %v882_v37 }
 0x186   :  { %2938 = vmatmul.mubr.msk.f32.gmra.mrb[32].mxu0 %vm950_vm0, %v2875_v36 }
 0x187   :  { %v3960_v38 = vpop.f32.mrb[2].mxu1 }
 0x188   :  { %v3962_v39 = vpop.f32.mrb[3].mxu1 }
 0x189   :  { %2902 = vmatprep.mubr.msk.f32.mxu1 %vm950_vm0, %v3962_v39 }
 0x18a   :  { %2903 = vmatmul.mubr.msk.f32.gmra.mrb[22].mxu1 %vm950_vm0, %v3960_v38 }
 0x18e   :  { %v3968_v40 = vpop.f32.mrb[4].mxu1 }
 0x18f   :  { %v3970_v41 = vpop.f32.mrb[5].mxu1  ;;  %v2878_v43 = vpop.f32.mrb[22].mxu0 }
 0x190   :  { %v892_v44 = vpop.f32.mrb[23].mxu0  ;;  %2905 = vmatprep.mubr.msk.f32.mxu1 %vm950_vm0, %v3970_v41 }
 0x191   :  { %2906 = vmatmul.mubr.msk.f32.gmra.mrb[24].mxu1 %vm950_vm0, %v3968_v40  ;;  %2940 = vmatprep.mubr.msk.f32.mxu0 %vm950_vm0, %v892_v44 }
 0x192   :  { %2941 = vmatmul.mubr.msk.f32.gmra.mrb[34].mxu0 %vm950_vm0, %v2878_v43 }
 0x193   :  { %v3978_v45 = vpop.f32.mrb[6].mxu1 }
 0x194   :  { %v3980_v46 = vpop.f32.mrb[7].mxu1 }
 0x195   :  { %2908 = vmatprep.mubr.msk.f32.mxu1 %vm950_vm0, %v3980_v46 }
 0x196   :  { %2909 = vmatmul.mubr.msk.f32.gmra.mrb[26].mxu1 %vm950_vm0, %v3978_v45 }
 0x19a   :  { %v3986_v47 = vpop.f32.mrb[8].mxu1 }
 0x19b   :  { %v3988_v48 = vpop.f32.mrb[9].mxu1  ;;  %v2881_v49 = vpop.f32.mrb[24].mxu0 }
 0x19c   :  { %v902_v50 = vpop.f32.mrb[25].mxu0  ;;  %2911 = vmatprep.mubr.msk.f32.mxu1 %vm950_vm0, %v3988_v48 }
 0x19d   :  { %2912 = vmatmul.mubr.msk.f32.gmra.mrb[28].mxu1 %vm950_vm0, %v3986_v47  ;;  %2943 = vmatprep.mubr.msk.f32.mxu0 %vm950_vm0, %v902_v50 }
 0x19e   :  { %2944 = vmatmul.mubr.msk.f32.gmra.mrb[36].mxu0 %vm950_vm0, %v2881_v49 }
 0x19f   :  { %v3996_v51 = vpop.f32.mrb[10].mxu1 }
 0x1a0   :  { %v3998_v52 = vpop.f32.mrb[11].mxu1 }
 0x1a1   :  { %2914 = vmatprep.mubr.msk.f32.mxu1 %vm950_vm0, %v3998_v52 }
 0x1a2   :  { %2915 = vmatmul.mubr.msk.f32.gmra.mrb[30].mxu1 %vm950_vm0, %v3996_v51 }
 0x1a6   :  { %v4004_v53 = vpop.f32.mrb[12].mxu1 }
 0x1a7   :  { %v4006_v54 = vpop.f32.mrb[13].mxu1  ;;  %v2884_v55 = vpop.f32.mrb[26].mxu0 }
 0x1a8   :  { %v912_v56 = vpop.f32.mrb[27].mxu0  ;;  %2917 = vmatprep.mubr.msk.f32.mxu1 %vm950_vm0, %v4006_v54 }
 0x1a9   :  { %2918 = vmatmul.mubr.msk.f32.gmra.mrb[32].mxu1 %vm950_vm0, %v4004_v53  ;;  %2946 = vmatprep.mubr.msk.f32.mxu0 %vm950_vm0, %v912_v56 }
 0x1aa   :  { %2947 = vmatmul.mubr.msk.f32.gmra.mrb[38].mxu0 %vm950_vm0, %v2884_v55 }
 0x1ab   :  { %v4014_v57 = vpop.f32.mrb[14].mxu1 }
 0x1ac   :  { %v4016_v58 = vpop.f32.mrb[15].mxu1 }
 0x1ad   :  { %2920 = vmatprep.mubr.msk.f32.mxu1 %vm950_vm0, %v4016_v58 }
 0x1ae   :  { %2921 = vmatmul.mubr.msk.f32.gmra.mrb[34].mxu1 %vm950_vm0, %v4014_v57 }
 0x1b0   :  { %v2887_v59 = vpop.f32.mrb[16].mxu1 }
 0x1b1   :  { %v922_v25 = vpop.f32.mrb[17].mxu1 }
 0x1b2   :  { %2949 = vmatprep.mubr.msk.f32.mxu0 %vm950_vm0, %v922_v25 }
 0x1b3   :  { %2950 = vmatmul.mubr.msk.f32.gmra.mrb[40].mxu0 %vm950_vm0, %v2887_v59 }
 0x1b4   :  { %v2890_v28 = vpop.f32.mrb[18].mxu1 }
 0x1b5   :  { %v932_v60 = vpop.f32.mrb[19].mxu1 }
 0x1b6   :  { %2952 = vmatprep.mubr.msk.f32.mxu0 %vm950_vm0, %v932_v60 }
 0x1b7   :  { %2953 = vmatmul.mubr.msk.f32.gmra.mrb[42].mxu0 %vm950_vm0, %v2890_v28 }
 0x251   :  { %v2933_v62 = vpop.f32.mrb[28].mxu0 }
 0x252   :  { %v1346_v63 = vadd.f32 %v2933_v62, %v3912_v12  ;;  %v1370_v0 = vadd.f32 %v2933_v62, %v4026_v61  ;;  %v1262_v1 = vpop.f32.mrb[29].mxu0 }
 0x253   :  { %v1369_v2 = vadd.f32 %v4026_v61, %v1262_v1  ;;  %v1345_v3 = vadd.f32 %v3912_v12, %v1262_v1 }
 0x255   :  { %v3287_v5 = vpack.i.bf16 %v1370_v0, %v1369_v2  ;;  %v3179_v6 = vpack.c.bf16 %v1346_v63, %v1345_v3  ;;  %v2936_v7 = vpop.f32.mrb[30].mxu0 }
 0x256   :  { %v1348_v8 = vadd.f32 %v2936_v7, %v3912_v12  ;;  %v1372_v9 = vadd.f32 %v2936_v7, %v4026_v61  ;;  %v1272_v30 = vpop.f32.mrb[31].mxu0 }
 0x257   :  { %v1371_v31 = vadd.f32 %v4026_v61, %v1272_v30  ;;  %v1347_v32 = vadd.f32 %v3912_v12, %v1272_v30  ;;  %3288 = vrot.lane.b32.xlu1 %v3287_v5, %s3419_s10  ;;  %3181 = vmatprep.subr.msk.bf16.mxu1 %vm4034_vm4, %v3179_v6 }
 0x258   :  { %v2901_v33 = vpop.f32.mrb[20].mxu1  ;;  %3184 = vmatpush3.bf16.xpose.msk.msra.mxu1 %vm4034_vm4, %v3179_v6 }
 0x259   :  { %v3292_v36 = vpack.i.bf16 %v1372_v9, %v1371_v31  ;;  %v3185_v37 = vpack.c.bf16 %v1348_v8, %v1347_v32  ;;  %v4048_v43 = vadd.f32 %v2901_v33, %v3910_v11  ;;  %v1065_v44 = vpop.f32.mrb[21].mxu1  ;;  %v2939_v49 = vpop.f32.mrb[32].mxu0 }
 0x25a   :  { %v1066_v50 = vadd.f32 %v1065_v44, %v3910_v11  ;;  %v1350_v55 = vadd.f32 %v2939_v49, %v3912_v12  ;;  %v1374_v56 = vadd.f32 %v2939_v49, %v4026_v61  ;;  %v1282_v59 = vpop.f32.mrb[33].mxu0 }
 0x25b   :  { %v1373_v25 = vadd.f32 %v4026_v61, %v1282_v59  ;;  %v1349_v28 = vadd.f32 %v3912_v12, %v1282_v59  ;;  %3293 = vrot.lane.b32.xlu1 %v3292_v36, %s3419_s10  ;;  %3187 = vmatprep.subr.msk.bf16.mxu1 %vm4034_vm4, %v3185_v37 }
 0x25c   :  { %2987 = vmatprep.mubr.msk.f32.mxu1 %vm950_vm0, %v1066_v50 }
 0x25d   :  { %v3297_v60 = vpack.i.bf16 %v1374_v56, %v1373_v25  ;;  %v3191_v62 = vpack.c.bf16 %v1350_v55, %v1349_v28  ;;  %v2904_v63 = vpop.f32.mrb[22].mxu1 }
 0x25e   :  { %v4060_v0 = vadd.f32 %v2904_v63, %v3910_v11  ;;  %v1075_v1 = vpop.f32.mrb[23].mxu1 }
 0x25f   :  { %v4063_v2 = vadd.f32 %v1075_v1, %v3910_v11  ;;  %3298 = vrot.lane.b32.xlu0 %v3297_v60, %s3419_s10 }
 0x260   :  { %3190 = vmatpush3.bf16.xpose.msk.msra.mxu1 %vm4034_vm4, %v3185_v37 }
 0x261   :  { %3193 = vmatprep.subr.msk.bf16.mxu1 %vm4034_vm4, %v3191_v62 }
 0x264   :  { %v2907_v3 = vpop.f32.mrb[24].mxu1 }
 0x265   :  { %v4071_v5 = vadd.f32 %v2907_v3, %v3910_v11  ;;  %v1085_v6 = vpop.f32.mrb[25].mxu1  ;;  %v2942_v7 = vpop.f32.mrb[34].mxu0 }
 0x266   :  { %v4074_v8 = vadd.f32 %v1085_v6, %v3910_v11  ;;  %v1352_v9 = vadd.f32 %v2942_v7, %v3912_v12  ;;  %v1376_v30 = vadd.f32 %v2942_v7, %v4026_v61  ;;  %v1292_v31 = vpop.f32.mrb[35].mxu0 }
 0x267   :  { %v1375_v32 = vadd.f32 %v4026_v61, %v1292_v31  ;;  %v1351_v33 = vadd.f32 %v3912_v12, %v1292_v31 }
 0x268   :  { %3196 = vmatpush3.bf16.xpose.msk.msra.mxu1 %vm4034_vm4, %v3191_v62 }
 0x269   :  { %v3302_v36 = vpack.i.bf16 %v1376_v30, %v1375_v32  ;;  %v3197_v37 = vpack.c.bf16 %v1352_v9, %v1351_v33  ;;  %v2910_v44 = vpop.f32.mrb[26].mxu1 }
 0x26a   :  { %v4083_v49 = vadd.f32 %v2910_v44, %v3910_v11  ;;  %v1095_v50 = vpop.f32.mrb[27].mxu1 }
 0x26b   :  { %v4086_v55 = vadd.f32 %v1095_v50, %v3910_v11  ;;  %3303 = vrot.lane.b32.xlu1 %v3302_v36, %s3419_s10  ;;  %3199 = vmatprep.subr.msk.bf16.mxu1 %vm4034_vm4, %v3197_v37 }
 0x270   :  { %v2913_v56 = vpop.f32.mrb[28].mxu1  ;;  %3202 = vmatpush3.bf16.xpose.msk.msra.mxu1 %vm4034_vm4, %v3197_v37 }
 0x271   :  { %v4094_v59 = vadd.f32 %v2913_v56, %v3910_v11  ;;  %v1105_v25 = vpop.f32.mrb[29].mxu1  ;;  %v2945_v28 = vpop.f32.mrb[36].mxu0 }
 0x272   :  { %v1106_v60 = vadd.f32 %v1105_v25, %v3910_v11  ;;  %v1354_v62 = vadd.f32 %v2945_v28, %v3912_v12  ;;  %v1378_v63 = vadd.f32 %v2945_v28, %v4026_v61  ;;  %v1302_v1 = vpop.f32.mrb[37].mxu0 }
 0x273   :  { %v1377_v3 = vadd.f32 %v4026_v61, %v1302_v1  ;;  %v1353_v6 = vadd.f32 %v3912_v12, %v1302_v1 }
 0x275   :  { %v3307_v7 = vpack.i.bf16 %v1378_v63, %v1377_v3  ;;  %v3203_v9 = vpack.c.bf16 %v1354_v62, %v1353_v6  ;;  %v2916_v30 = vpop.f32.mrb[30].mxu1 }
 0x276   :  { %v1121_v31 = vadd.f32 %v2916_v30, %v3910_v11  ;;  %v1115_v32 = vpop.f32.mrb[31].mxu1 }
 0x277   :  { %v1116_v33 = vadd.f32 %v1115_v32, %v3910_v11  ;;  %3308 = vrot.lane.b32.xlu0 %v3307_v7, %s3419_s10  ;;  %3205 = vmatprep.subr.msk.bf16.mxu1 %vm4034_vm4, %v3203_v9 }
 0x278   :  { %3208 = vmatpush3.bf16.xpose.msk.msra.mxu1 %vm4034_vm4, %v3203_v9 }
 0x27c   :  { %v2919_v36 = vpop.f32.mrb[32].mxu1 }
 0x27d   :  { %v1131_v37 = vadd.f32 %v2919_v36, %v3910_v11  ;;  %v1125_v44 = vpop.f32.mrb[33].mxu1  ;;  %v2948_v50 = vpop.f32.mrb[38].mxu0 }
 0x27e   :  { %v1126_v56 = vadd.f32 %v1125_v44, %v3910_v11  ;;  %v1356_v25 = vadd.f32 %v2948_v50, %v3912_v12  ;;  %v1380_v28 = vadd.f32 %v2948_v50, %v4026_v61  ;;  %v1312_v62 = vpop.f32.mrb[39].mxu0 }
 0x27f   :  { %v1379_v63 = vadd.f32 %v4026_v61, %v1312_v62  ;;  %v1355_v1 = vadd.f32 %v3912_v12, %v1312_v62 }
 0x281   :  { %v3312_v3 = vpack.i.bf16 %v1380_v28, %v1379_v63  ;;  %v3209_v6 = vpack.c.bf16 %v1356_v25, %v1355_v1  ;;  %v2922_v7 = vpop.f32.mrb[34].mxu1 }
 0x282   :  { %v1141_v9 = vadd.f32 %v2922_v7, %v3910_v11  ;;  %v1135_v30 = vpop.f32.mrb[35].mxu1 }
 0x283   :  { %v1136_v32 = vadd.f32 %v1135_v30, %v3910_v11  ;;  %3313 = vrot.lane.b32.xlu1 %v3312_v3, %s3419_s10  ;;  %3211 = vmatprep.subr.msk.bf16.mxu1 %vm4034_vm4, %v3209_v6 }
 0x284   :  { %3214 = vmatpush3.bf16.xpose.msk.msra.mxu1 %vm4034_vm4, %v3209_v6 }
 0x286   :  { %v2951_v36 = vpop.f32.mrb[40].mxu0 }
 0x287   :  { %v1358_v44 = vadd.f32 %v2951_v36, %v3912_v12  ;;  %v4123_v50 = vadd.f32 %v2951_v36, %v4026_v61  ;;  %v1322_v25 = vpop.f32.mrb[41].mxu0 }
 0x288   :  { %v4126_v28 = vadd.f32 %v4026_v61, %v1322_v25  ;;  %v1357_v11 = vadd.f32 %v3912_v12, %v1322_v25 }
 0x28a   :  { %v3317_v62 = vpack.i.bf16 %v4123_v50, %v4126_v28  ;;  %v3215_v63 = vpack.c.bf16 %v1358_v44, %v1357_v11  ;;  %v2954_v1 = vpop.f32.mrb[42].mxu0  ;;  %v1399_v50 = vld [vmem:[%s4453_s3 + $0x70] sm:$0xff] }
 0x28b   :  { %v1360_v3 = vadd.f32 %v2954_v1, %v3912_v12  ;;  %v4133_v6 = vadd.f32 %v2954_v1, %v4026_v61  ;;  %v1332_v7 = vpop.f32.mrb[43].mxu0 }
 0x28c   :  { %v4136_v30 = vadd.f32 %v4026_v61, %v1332_v7  ;;  %v1359_v36 = vadd.f32 %v3912_v12, %v1332_v7  ;;  %3217 = vmatprep.subr.msk.bf16.mxu1 %vm4034_vm4, %v3215_v63 }
 0x28d   :  { %3220 = vmatpush3.bf16.xpose.msk.msra.mxu1 %vm4034_vm4, %v3215_v63 }
 0x28e   :  { %v3322_v44 = vpack.i.bf16 %v4133_v6, %v4136_v30  ;;  %v3221_v25 = vpack.c.bf16 %v1360_v3, %v1359_v36  ;;  %v1398_v30 = vld [vmem:[%s4453_s3 + $0x68] sm:$0xff] }
 0x290   :  { %3223 = vmatprep.subr.msk.bf16.mxu1 %vm4034_vm4, %v3221_v25 }
 0x295   :  { %3226 = vmatpush3.bf16.xpose.msk.msra.mxu1 %vm4034_vm4, %v3221_v25  ;;  %v1386_v25 = vld [vmem:[%s4453_s3 + $0x8] sm:$0xff] }
 0x29c   :  { %2988 = vmatmul.mubr.msk.f32.vlgmr.msra.gmra.mrb[36].mxu1 %vm950_vm0, %v4048_v43 }
 0x29d   :  { %2990 = vmatprep.mubr.msk.f32.mxu1 %vm950_vm0, %v4063_v2 }
 0x2a0   :  { %2991 = vmatmul.mubr.msk.f32.gmra.mrb[38].mxu1 %vm950_vm0, %v4060_v0 }
 0x2a1   :  { %2993 = vmatprep.mubr.msk.f32.mxu1 %vm950_vm0, %v4074_v8 }
 0x2a4   :  { %2994 = vmatmul.mubr.msk.f32.gmra.mrb[40].mxu1 %vm950_vm0, %v4071_v5 }
 0x2a5   :  { %2996 = vmatprep.mubr.msk.f32.mxu1 %vm950_vm0, %v4086_v55 }
 0x2a8   :  { %2997 = vmatmul.mubr.msk.f32.gmra.mrb[42].mxu1 %vm950_vm0, %v4083_v49 }
 0x2a9   :  { %2999 = vmatprep.mubr.msk.f32.mxu1 %vm950_vm0, %v1106_v60 }
 0x2ac   :  { %3000 = vmatmul.mubr.msk.f32.gmra.mrb[44].mxu1 %vm950_vm0, %v4094_v59 }
 0x2ad   :  { %3002 = vmatprep.mubr.msk.f32.mxu1 %vm950_vm0, %v1116_v33 }
 0x2b0   :  { %3003 = vmatmul.mubr.msk.f32.gmra.mrb[46].mxu1 %vm950_vm0, %v1121_v31 }
 0x2b1   :  { %3005 = vmatprep.mubr.msk.f32.mxu1 %vm950_vm0, %v1126_v56 }
 0x2b4   :  { %3006 = vmatmul.mubr.msk.f32.gmra.mrb[48].mxu1 %vm950_vm0, %v1131_v37 }
 0x2b5   :  { %3008 = vmatprep.mubr.msk.f32.mxu1 %vm950_vm0, %v1136_v32 }
 0x2b8   :  { %3009 = vmatmul.mubr.msk.f32.gmra.mrb[50].mxu1 %vm950_vm0, %v1141_v9 }
 0x2c9   :  { %v3289_v12 = vpop.permute.xlu1 %3288 }
 0x2ca   :  { %v3291_v61 = vunpack.i.h.bf16 %v3289_v12  ;;  %v3290_v4 = vunpack.i.l.bf16 %v3289_v12  ;;  %v1385_v12 = vld [vmem:[%s4453_s3] sm:$0xff] }
 0x2cc   :  { %v3227_v43 = vpack.c.bf16 %v3291_v61, %v3290_v4 }
 0x2cd   :  { %v3294_v0 = vpop.permute.xlu1 %3293 }
 0x2ce   :  { %v3296_v2 = vunpack.i.h.bf16 %v3294_v0  ;;  %v3295_v5 = vunpack.i.l.bf16 %v3294_v0  ;;  %3228 = vmatprep.subr.bf16.mxu0 %v3227_v43 }
 0x2cf   :  { %3230 = vmatpush3.bf16.msra.mxu0 %v3227_v43 }
 0x2d0   :  { %v3231_v8 = vpack.c.bf16 %v3296_v2, %v3295_v5  ;;  %v1388_v2 = vld [vmem:[%s4453_s3 + $0x18] sm:$0xff]  ;;  %v1387_v5 = vld [vmem:[%s4453_s3 + $0x10] sm:$0xff] }
 0x2d1   :  { %v3299_v49 = vpop.permute.xlu0 %3298 }
 0x2d2   :  { %v3301_v55 = vunpack.i.h.bf16 %v3299_v49  ;;  %v3300_v59 = vunpack.i.l.bf16 %v3299_v49  ;;  %3232 = vmatprep.subr.bf16.mxu0 %v3231_v8 }
 0x2d3   :  { %3234 = vmatpush3.bf16.msra.mxu0 %v3231_v8 }
 0x2d4   :  { %v3235_v60 = vpack.c.bf16 %v3301_v55, %v3300_v59 }
 0x2d6   :  { %3236 = vmatprep.subr.bf16.mxu0 %v3235_v60 }
 0x2d7   :  { %3238 = vmatpush3.bf16.msra.mxu0 %v3235_v60  ;;  %v1390_v60 = vld [vmem:[%s4453_s3 + $0x28] sm:$0xff] }
 0x2dd   :  { %v3304_v31 = vpop.permute.xlu1 %3303 }
 0x2de   :  { %v3306_v33 = vunpack.i.h.bf16 %v3304_v31  ;;  %v3305_v37 = vunpack.i.l.bf16 %v3304_v31  ;;  %v1389_v31 = vld [vmem:[%s4453_s3 + $0x20] sm:$0xff] }
 0x2e0   :  { %v3239_v56 = vpack.c.bf16 %v3306_v33, %v3305_v37 }
 0x2e2   :  { %3240 = vmatprep.subr.bf16.mxu0 %v3239_v56 }
 0x2e3   :  { %3242 = vmatpush3.bf16.msra.mxu0 %v3239_v56 }
 0x2e9   :  { %v3309_v9 = vpop.permute.xlu0 %3308 }
 0x2ea   :  { %v3311_v32 = vunpack.i.h.bf16 %v3309_v9  ;;  %v3310_v11 = vunpack.i.l.bf16 %v3309_v9 }
 0x2ec   :  { %v3243_v63 = vpack.c.bf16 %v3311_v32, %v3310_v11  ;;  %v1392_v32 = vld [vmem:[%s4453_s3 + $0x38] sm:$0xff] }
 0x2ee   :  { %3244 = vmatprep.subr.bf16.mxu0 %v3243_v63 }
 0x2ef   :  { %3246 = vmatpush3.bf16.msra.mxu0 %v3243_v63 }
 0x2f5   :  { %v3314_v1 = vpop.permute.xlu1 %3313 }
 0x2f6   :  { %v3316_v3 = vunpack.i.h.bf16 %v3314_v1  ;;  %v3315_v7 = vunpack.i.l.bf16 %v3314_v1 }
 0x2f8   :  { %v3247_v36 = vpack.c.bf16 %v3316_v3, %v3315_v7  ;;  %v1391_v3 = vld [vmem:[%s4453_s3 + $0x30] sm:$0xff] }
 0x2fa   :  { %3248 = vmatprep.subr.bf16.mxu0 %v3247_v36 }
 0x2fb   :  { %3250 = vmatpush3.bf16.msra.mxu0 %v3247_v36 }
 0x36f   :  { %v2989_v61 = vpop.f32.mrb[36].mxu1 }
 0x370   :  { %v4178_v4 = vadd.f32 %v2989_v61, %v1386_v25  ;;  %v1563_v43 = vpop.f32.mrb[37].mxu1 }
 0x371   :  { %v4180_v0 = vadd.f32 %v1563_v43, %v1385_v12  ;;  %v1393_v12 = vld [vmem:[%s4453_s3 + $0x40] sm:$0xff] }
 0x372   :  { %1644 = vmax.xlane.f32.xlu1 %v4178_v4 }
 0x373   :  { %v2992_v8 = vpop.f32.mrb[38].mxu1  ;;  %1642 = vmax.xlane.f32.xlu0 %v4180_v0 }
 0x374   :  { %v4190_v49 = vadd.f32 %v2992_v8, %v1388_v2  ;;  %v1573_v55 = vpop.f32.mrb[39].mxu1 }
 0x375   :  { %v4192_v59 = vadd.f32 %v1573_v55, %v1387_v5  ;;  %v1396_v5 = vld [vmem:[%s4453_s3 + $0x58] sm:$0xff] }
 0x376   :  { %1648 = vmax.xlane.f32.xlu1 %v4190_v49 }
 0x377   :  { %v2995_v33 = vpop.f32.mrb[40].mxu1  ;;  %1646 = vmax.xlane.f32.xlu0 %v4192_v59 }
 0x378   :  { %v4202_v37 = vadd.f32 %v2995_v33, %v1390_v60  ;;  %v1583_v56 = vpop.f32.mrb[41].mxu1 }
 0x379   :  { %v4204_v9 = vadd.f32 %v1583_v56, %v1389_v31  ;;  %v1395_v31 = vld [vmem:[%s4453_s3 + $0x50] sm:$0xff] }
 0x37b   :  { %v2998_v11 = vpop.f32.mrb[42].mxu1  ;;  %1650 = vmax.xlane.f32.xlu1 %v4204_v9  ;;  %1652 = vmax.xlane.f32.xlu0 %v4202_v37 }
 0x37c   :  { %v4211_v63 = vadd.f32 %v2998_v11, %v1392_v32  ;;  %v1593_v1 = vpop.f32.mrb[43].mxu1  ;;  %v1394_v11 = vld [vmem:[%s4453_s3 + $0x48] sm:$0xff] }
 0x37d   :  { %v4217_v25 = vadd.f32 %v1593_v1, %v1391_v3  ;;  %v1397_v3 = vld [vmem:[%s4453_s3 + $0x60] sm:$0xff] }
 0x37f   :  { %v3001_v7 = vpop.f32.mrb[44].mxu1  ;;  %1656 = vmax.xlane.f32.xlu1 %v4211_v63 }
 0x380   :  { %v1603_v36 = vpop.f32.mrb[45].mxu1  ;;  %v4249_v1 = vadd.f32 %v3001_v7, %v1394_v11 }
 0x381   :  { %v4223_v2 = vadd.f32 %v1603_v36, %v1393_v12 }
 0x383   :  { %v3004_v61 = vpop.f32.mrb[46].mxu1  ;;  %1654 = vmax.xlane.f32.xlu1 %v4217_v25 }
 0x384   :  { %v1613_v43 = vpop.f32.mrb[47].mxu1  ;;  %v4229_v60 = vadd.f32 %v3004_v61, %v1396_v5 }
 0x385   :  { %v4235_v32 = vadd.f32 %v1613_v43, %v1395_v31 }
 0x387   :  { %v3007_v8 = vpop.f32.mrb[48].mxu1  ;;  %1658 = vmax.xlane.f32.xlu1 %v4223_v2 }
 0x388   :  { %v1623_v55 = vpop.f32.mrb[49].mxu1 }
 0x389   :  { %v4255_v36 = vadd.f32 %v1623_v55, %v1397_v3 }
 0x38b   :  { %v3010_v33 = vpop.f32.mrb[50].mxu1  ;;  %1664 = vmax.xlane.f32.xlu1 %v4229_v60 }
 0x38c   :  { %v1633_v56 = vpop.f32.mrb[51].mxu1 }
 0x38d   :  { %v4261_v28 = vadd.f32 %v1633_v56, %v1399_v50 }
 0x38f   :  { %1662 = vmax.xlane.f32.xlu1 %v4235_v32 }
 0x391   :  { %3318 = vrot.lane.b32.xlu0 %v3317_v62, %s3419_s10  ;;  %v1400_v62 = vld [vmem:[%s4453_s3 + $0x78] sm:$0xff]  ;;  %s3420_s3 = smov 16  }
 0x392   :  { %v4267_v6 = vadd.f32 %v3010_v33, %v1400_v62 }
 0x3a0   :  { %3323 = vrot.lane.b32.xlu1 %v3322_v44, %s3419_s10  ;;  %v4273_v44 = vadd.f32 %v3007_v8, %v1398_v30 }
 0x3b0   :  { %1660 = vmax.xlane.f32.xlu0 %v4249_v1 }
 0x3b4   :  { %1666 = vmax.xlane.f32.xlu0 %v4255_v36 }
 0x3b8   :  { %1670 = vmax.xlane.f32.xlu0 %v4261_v28 }
 0x3bc   :  { %1672 = vmax.xlane.f32.xlu0 %v4267_v6 }
 0x3c4   :  { %1668 = vmax.xlane.f32.xlu1 %v4273_v44 }
 0x3ff   :  { %v1645_v7 = vpop.xlane.xlu1 %1644 }
 0x400   :  { %v1675_v12 = vsub.f32 %v4178_v4, %v1645_v7  ;;  %v1643_v61 = vpop.xlane.xlu0 %1642 }
 0x401   :  { %v1674_v43 = vsub.f32 %v4180_v0, %v1643_v61 }
 0x402   :  { %v1692_v5 = vmul.f32 1.442695, %v1675_v12 }
 0x403   :  { %v1690_v55 = vmul.f32 1.442695, %v1674_v43  ;;  %v1649_v31 = vpop.xlane.xlu1 %1648 }
 0x404   :  { %3327 = vpow2.f32 %v1692_v5  ;;  %v1677_v33 = vsub.f32 %v4190_v49, %v1649_v31  ;;  %v1647_v56 = vpop.xlane.xlu0 %1646 }
 0x405   :  { %3329 = vpow2.f32 %v1690_v55  ;;  %v1676_v8 = vsub.f32 %v4192_v59, %v1647_v56 }
 0x406   :  { %v1696_v11 = vmul.f32 1.442695, %v1677_v33 }
 0x407   :  { %v1694_v4 = vmul.f32 1.442695, %v1676_v8 }
 0x408   :  { %v1651_v3 = vpop.xlane.xlu1 %1650  ;;  %v1653_v50 = vpop.xlane.xlu0 %1652  ;;  %3331 = vpow2.f32 %v1696_v11 }
 0x409   :  { %v1679_v62 = vsub.f32 %v4202_v37, %v1653_v50  ;;  %v1678_v0 = vsub.f32 %v4204_v9, %v1651_v3 }
 0x40b   :  { %v1700_v30 = vmul.f32 1.442695, %v1679_v62  ;;  %v1698_v33 = vmul.f32 1.442695, %v1678_v0 }
 0x40c   :  { %v1657_v7 = vpop.xlane.xlu1 %1656  ;;  %v3319_v12 = vpop.permute.xlu0 %3318 }
 0x40d   :  { %v1681_v61 = vsub.f32 %v4211_v63, %v1657_v7  ;;  %v3321_v43 = vunpack.i.h.bf16 %v3319_v12  ;;  %v3320_v49 = vunpack.i.l.bf16 %v3319_v12  ;;  %3333 = vpow2.f32 %v1700_v30 }
 0x40e   :  { %v3328_v5 = vpop.eup %3327  ;;  %3335 = vpow2.f32 %v1694_v4 }
 0x40f   :  { %v3330_v55 = vpop.eup %3329  ;;  %v1704_v31 = vmul.f32 1.442695, %v1681_v61  ;;  %v3251_v59 = vpack.c.bf16 %v3321_v43, %v3320_v49  ;;  %1724 = vadd.xlane.f32.xlu0 %v3328_v5 }
 0x410   :  { %v1655_v37 = vpop.xlane.xlu1 %1654  ;;  %3043 = vmatprep.mubr.f32.mxu0 %v3330_v55 }
 0x411   :  { %3337 = vpow2.f32 %v1704_v31  ;;  %v1680_v56 = vsub.f32 %v4217_v25, %v1655_v37  ;;  %3252 = vmatprep.subr.bf16.mxu0 %v3251_v59 }
 0x412   :  { %3254 = vmatpush3.bf16.msra.mxu0 %v3251_v59  ;;  %3339 = vpow2.f32 %v1698_v33  ;;  %v3332_v8 = vpop.eup %3331 }
 0x413   :  { %1722 = vadd.xlane.f32.xlu0 %v3330_v55  ;;  %v1702_v9 = vmul.f32 1.442695, %v1680_v56 }
 0x414   :  { %v1659_v63 = vpop.xlane.xlu1 %1658 }
 0x415   :  { %v1682_v11 = vsub.f32 %v4223_v2, %v1659_v63  ;;  %3341 = vpow2.f32 %v1702_v9 }
 0x417   :  { %1728 = vadd.xlane.f32.xlu0 %v3332_v8  ;;  %v3334_v3 = vpop.eup %3333  ;;  %v1706_v50 = vmul.f32 1.442695, %v1682_v11 }
 0x418   :  { %v1665_v62 = vpop.xlane.xlu1 %1664  ;;  %1732 = vadd.xlane.f32.xlu1 %v3334_v3  ;;  %v3336_v30 = vpop.eup %3335 }
 0x419   :  { %3343 = vpow2.f32 %v1706_v50 }
 0x41b   :  { %v3338_v4 = vpop.eup %3337  ;;  %1726 = vadd.xlane.f32.xlu0 %v3336_v30 }
 0x41c   :  { %v1663_v25 = vpop.xlane.xlu1 %1662  ;;  %1736 = vadd.xlane.f32.xlu1 %v3338_v4  ;;  %v3340_v7 = vpop.eup %3339 }
 0x41d   :  { %v1684_v0 = vsub.f32 %v4235_v32, %v1663_v25  ;;  %v1685_v32 = vsub.f32 %v4229_v60, %v1665_v62 }
 0x41f   :  { %v1710_v12 = vmul.f32 1.442695, %v1684_v0  ;;  %1730 = vadd.xlane.f32.xlu0 %v3340_v7  ;;  %v3342_v49 = vpop.eup %3341  ;;  %v1712_v9 = vmul.f32 1.442695, %v1685_v32 }
 0x420   :  { %v3324_v61 = vpop.permute.xlu1 %3323 }
 0x421   :  { %3345 = vpow2.f32 %v1710_v12  ;;  %v3326_v2 = vunpack.i.h.bf16 %v3324_v61  ;;  %v3325_v43 = vunpack.i.l.bf16 %v3324_v61 }
 0x423   :  { %v3255_v55 = vpack.c.bf16 %v3326_v2, %v3325_v43  ;;  %1734 = vadd.xlane.f32.xlu0 %v3342_v49  ;;  %v3344_v31 = vpop.eup %3343 }
 0x425   :  { %3256 = vmatprep.subr.bf16.mxu0 %v3255_v55 }
 0x426   :  { %3258 = vmatpush3.bf16.msra.mxu0 %v3255_v55 }
 0x427   :  { %1738 = vadd.xlane.f32.xlu0 %v3344_v31 }
 0x429   :  { %3044 = vmatmul.mubr.f32.vlgmr.msra.gmra.mrb[44].mxu0 %v3328_v5 }
 0x42a   :  { %3046 = vmatprep.mubr.f32.mxu0 %v3336_v30 }
 0x42b   :  { %v3346_v59 = vpop.eup %3345 }
 0x42c   :  { %1742 = vadd.xlane.f32.xlu0 %v3346_v59 }
 0x42d   :  { %3047 = vmatmul.mubr.f32.gmra.mrb[46].mxu0 %v3332_v8 }
 0x42e   :  { %3049 = vmatprep.mubr.f32.mxu0 %v3340_v7 }
 0x431   :  { %3050 = vmatmul.mubr.f32.gmra.mrb[48].mxu0 %v3334_v3 }
 0x432   :  { %3052 = vmatprep.mubr.f32.mxu0 %v3342_v49 }
 0x435   :  { %3053 = vmatmul.mubr.f32.gmra.mrb[50].mxu0 %v3338_v4 }
 0x436   :  { %3055 = vmatprep.mubr.f32.mxu0 %v3344_v31 }
 0x43d   :  { %v1661_v33 = vpop.xlane.xlu0 %1660 }
 0x43e   :  { %v1683_v37 = vsub.f32 %v4249_v1, %v1661_v33 }
 0x440   :  { %v1708_v56 = vmul.f32 1.442695, %v1683_v37 }
 0x441   :  { %v1667_v63 = vpop.xlane.xlu0 %1666 }
 0x442   :  { %3347 = vpow2.f32 %v1708_v56  ;;  %v1686_v5 = vsub.f32 %v4255_v36, %v1667_v63 }
 0x443   :  { %3349 = vpow2.f32 %v1712_v9 }
 0x444   :  { %v1714_v11 = vmul.f32 1.442695, %v1686_v5 }
 0x445   :  { %v1671_v50 = vpop.xlane.xlu0 %1670 }
 0x446   :  { %3351 = vpow2.f32 %v1714_v11  ;;  %v1688_v8 = vsub.f32 %v4261_v28, %v1671_v50 }
 0x448   :  { %v1718_v3 = vmul.f32 1.442695, %v1688_v8 }
 0x449   :  { %v1673_v1 = vpop.xlane.xlu0 %1672 }
 0x44a   :  { %3353 = vpow2.f32 %v1718_v3  ;;  %v1689_v36 = vsub.f32 %v4267_v6, %v1673_v1  ;;  %v1995_v6 = vld [vmem:[%s4459_s9] sm:$0xff] }
 0x44c   :  { %v3348_v30 = vpop.eup %3347  ;;  %v1720_v7 = vmul.f32 1.442695, %v1689_v36 }
 0x44d   :  { %1740 = vadd.xlane.f32.xlu1 %v3348_v30  ;;  %3056 = vmatmul.mubr.f32.gmra.mrb[52].mxu0 %v3348_v30  ;;  %v3350_v60 = vpop.eup %3349 }
 0x44e   :  { %3058 = vmatprep.mubr.f32.mxu0 %v3346_v59 }
 0x450   :  { %v3352_v62 = vpop.eup %3351 }
 0x451   :  { %v1669_v4 = vpop.xlane.xlu1 %1668  ;;  %1744 = vadd.xlane.f32.xlu1 %v3350_v60  ;;  %1746 = vadd.xlane.f32.xlu0 %v3352_v62 }
 0x452   :  { %v1687_v25 = vsub.f32 %v4273_v44, %v1669_v4  ;;  %3059 = vmatmul.mubr.f32.gmra.mrb[54].mxu0 %v3350_v60  ;;  %v1996_v44 = vld [vmem:[%s4459_s9 + $0x8] sm:$0xff] }
 0x453   :  { %3061 = vmatprep.mubr.f32.mxu0 %v3352_v62  ;;  %v3259_v2 = vpack.c.bf16 %v1996_v44, %v1995_v6 }
 0x454   :  { %v3354_v0 = vpop.eup %3353  ;;  %v1716_v28 = vmul.f32 1.442695, %v1687_v25 }
 0x455   :  { %1750 = vadd.xlane.f32.xlu0 %v3354_v0  ;;  %3260 = vmatprep.subr.bf16.mxu0 %v3259_v2 }
 0x456   :  { %3355 = vpow2.f32 %v1716_v28  ;;  %3262 = vmatpush3.bf16.msra.mxu0 %v3259_v2 }
 0x457   :  { %3357 = vpow2.f32 %v1720_v7 }
 0x460   :  { %v3356_v12 = vpop.eup %3355 }
 0x461   :  { %1748 = vadd.xlane.f32.xlu1 %v3356_v12  ;;  %3062 = vmatmul.mubr.f32.gmra.mrb[56].mxu0 %v3356_v12  ;;  %v3358_v61 = vpop.eup %3357 }
 0x462   :  { %3064 = vmatprep.mubr.f32.mxu0 %v3354_v0 }
 0x465   :  { %1752 = vadd.xlane.f32.xlu1 %v3358_v61  ;;  %3065 = vmatmul.mubr.f32.gmra.mrb[58].mxu0 %v3358_v61 }
 0x46b   :  { %2196 = vrot.lane.b32.xlu0 %v3952_v35, %s3420_s3  ;;  %v1998_v35 = vld [vmem:[%s4459_s9 + $0x18] sm:$0xff] }
 0x46f   :  { %2202 = vrot.lane.b32.xlu0 %v3960_v38, %s3420_s3 }
 0x473   :  { %2206 = vrot.lane.b32.xlu0 %v3968_v40, %s3420_s3 }
 0x476   :  { %2198 = vrot.lane.b32.xlu1 %v3949_v34, %s3420_s3  ;;  %v1997_v34 = vld [vmem:[%s4459_s9 + $0x10] sm:$0xff]  ;;  %s3421_s9 = smov 48  }
 0x477   :  { %2210 = vrot.lane.b32.xlu0 %v3978_v45, %s3420_s3  ;;  %v3263_v38 = vpack.c.bf16 %v1998_v35, %v1997_v34 }
 0x479   :  { %3264 = vmatprep.subr.bf16.mxu0 %v3263_v38 }
 0x47a   :  { %2200 = vrot.lane.b32.xlu1 %v3962_v39, %s3420_s3  ;;  %3266 = vmatpush3.bf16.msra.mxu0 %v3263_v38 }
 0x47b   :  { %2214 = vrot.lane.b32.xlu0 %v3986_v47, %s3420_s3 }
 0x47e   :  { %2204 = vrot.lane.b32.xlu1 %v3970_v41, %s3420_s3 }
 0x47f   :  { %2218 = vrot.lane.b32.xlu0 %v3996_v51, %s3420_s3 }
 0x482   :  { %2208 = vrot.lane.b32.xlu1 %v3980_v46, %s3420_s3 }
 0x483   :  { %2222 = vrot.lane.b32.xlu0 %v4004_v53, %s3420_s3 }
 0x486   :  { %2212 = vrot.lane.b32.xlu1 %v3988_v48, %s3420_s3 }
 0x487   :  { %2226 = vrot.lane.b32.xlu0 %v4014_v57, %s3420_s3 }
 0x48a   :  { %2216 = vrot.lane.b32.xlu1 %v3998_v52, %s3420_s3 }
 0x48e   :  { %2220 = vrot.lane.b32.xlu1 %v4006_v54, %s3420_s3 }
 0x492   :  { %2224 = vrot.lane.b32.xlu1 %v4016_v58, %s3420_s3 }
 0x49c   :  { %v1725_v39 = vpop.xlane.xlu0 %1724 }
 0x4a0   :  { %v1723_v40 = vpop.xlane.xlu0 %1722 }
 0x4a1   :  { %3359 = vrcp.f32 %v1723_v40 }
 0x4a2   :  { %3361 = vrcp.f32 %v1725_v39 }
 0x4a4   :  { %v1729_v41 = vpop.xlane.xlu0 %1728 }
 0x4a5   :  { %v1733_v46 = vpop.xlane.xlu1 %1732 }
 0x4a8   :  { %v1727_v45 = vpop.xlane.xlu0 %1726 }
 0x4a9   :  { %3363 = vrcp.f32 %v1727_v45  ;;  %v1737_v52 = vpop.xlane.xlu1 %1736 }
 0x4aa   :  { %3365 = vrcp.f32 %v1729_v41 }
 0x4ab   :  { %v3360_v53 = vpop.eup %3359 }
 0x4ac   :  { %v1731_v47 = vpop.xlane.xlu0 %1730  ;;  %v3362_v54 = vpop.eup %3361 }
 0x4ad   :  { %3367 = vrcp.f32 %v1731_v47 }
 0x4ae   :  { %3369 = vrcp.f32 %v1733_v46 }
 0x4b0   :  { %v1735_v48 = vpop.xlane.xlu0 %1734 }
 0x4b1   :  { %3371 = vrcp.f32 %v1735_v48 }
 0x4b2   :  { %3373 = vrcp.f32 %v1737_v52 }
 0x4b3   :  { %v3364_v55 = vpop.eup %3363 }
 0x4b4   :  { %v3366_v59 = vpop.eup %3365  ;;  %v1739_v62 = vpop.xlane.xlu0 %1738 }
 0x4b5   :  { %3375 = vrcp.f32 %v1739_v62 }
 0x4b7   :  { %v3368_v56 = vpop.eup %3367 }
 0x4b8   :  { %v3370_v63 = vpop.eup %3369 }
 0x4b9   :  { %v1743_v36 = vpop.xlane.xlu0 %1742 }
 0x4bb   :  { %v3372_v8 = vpop.eup %3371 }
 0x4bc   :  { %v3374_v30 = vpop.eup %3373 }
 0x4bf   :  { %v3376_v28 = vpop.eup %3375 }
 0x4da   :  { %v1741_v4 = vpop.xlane.xlu1 %1740 }
 0x4db   :  { %3377 = vrcp.f32 %v1741_v4 }
 0x4dc   :  { %3379 = vrcp.f32 %v1743_v36 }
 0x4de   :  { %v1745_v25 = vpop.xlane.xlu1 %1744  ;;  %v1747_v34 = vpop.xlane.xlu0 %1746 }
 0x4df   :  { %3381 = vrcp.f32 %v1745_v25 }
 0x4e0   :  { %3383 = vrcp.f32 %v1747_v34 }
 0x4e2   :  { %v1751_v45 = vpop.xlane.xlu0 %1750 }
 0x4e5   :  { %v3378_v12 = vpop.eup %3377 }
 0x4e6   :  { %v3380_v2 = vpop.eup %3379 }
 0x4e9   :  { %v3382_v38 = vpop.eup %3381 }
 0x4ea   :  { %v3384_v48 = vpop.eup %3383 }
 0x4ee   :  { %v1749_v39 = vpop.xlane.xlu1 %1748 }
 0x4ef   :  { %3385 = vrcp.f32 %v1749_v39 }
 0x4f0   :  { %3387 = vrcp.f32 %v1751_v45 }
 0x4f2   :  { %v1753_v47 = vpop.xlane.xlu1 %1752 }
 0x4f3   :  { %3389 = vrcp.f32 %v1753_v47 }
 0x4f6   :  { %v2199_v45 = vpop.permute.xlu1 %2198 }
 0x4fc   :  { %v3045_v51 = vpop.f32.mrb[44].mxu0 }
 0x4fd   :  { %v1884_v57 = vpop.f32.mrb[45].mxu0  ;;  %v1980_v58 = vmul.f32 %v3362_v54, %v3045_v51 }
 0x4fe   :  { %v1979_v43 = vmul.f32 %v3360_v53, %v1884_v57  ;;  %v3386_v53 = vpop.eup %3385 }
 0x500   :  { %v3048_v49 = vpop.f32.mrb[46].mxu0  ;;  %3075 = vmatprep.mubr.msk.f32.mxu0 %vm950_vm0, %v1979_v43  ;;  %v3388_v43 = vpop.eup %3387 }
 0x501   :  { %v1894_v31 = vpop.f32.mrb[47].mxu0  ;;  %3076 = vmatmul.mubr.msk.f32.vlgmr.msra.gmra.mrb[60].mxu0 %vm950_vm0, %v1980_v58  ;;  %v1982_v33 = vmul.f32 %v3366_v59, %v3048_v49  ;;  %v3390_v49 = vpop.eup %3389 }
 0x502   :  { %v1981_v32 = vmul.f32 %v3364_v55, %v1894_v31 }
 0x504   :  { %v3051_v37 = vpop.f32.mrb[48].mxu0  ;;  %3078 = vmatprep.mubr.msk.f32.mxu0 %vm950_vm0, %v1981_v32 }
 0x505   :  { %v1904_v9 = vpop.f32.mrb[49].mxu0  ;;  %3079 = vmatmul.mubr.msk.f32.gmra.mrb[62].mxu0 %vm950_vm0, %v1982_v33  ;;  %v1984_v11 = vmul.f32 %v3370_v63, %v3051_v37 }
 0x506   :  { %v1983_v5 = vmul.f32 %v3368_v56, %v1904_v9 }
 0x508   :  { %v3054_v50 = vpop.f32.mrb[50].mxu0  ;;  %3081 = vmatprep.mubr.msk.f32.mxu0 %vm950_vm0, %v1983_v5 }
 0x509   :  { %v1914_v3 = vpop.f32.mrb[51].mxu0  ;;  %3082 = vmatmul.mubr.msk.f32.gmra.mrb[64].mxu0 %vm950_vm0, %v1984_v11  ;;  %v1986_v1 = vmul.f32 %v3374_v30, %v3054_v50 }
 0x50a   :  { %v1985_v60 = vmul.f32 %v3372_v8, %v1914_v3 }
 0x50c   :  { %3084 = vmatprep.mubr.msk.f32.mxu0 %vm950_vm0, %v1985_v60 }
 0x50d   :  { %3085 = vmatmul.mubr.msk.f32.gmra.mrb[66].mxu0 %vm950_vm0, %v1986_v1 }
 0x520   :  { %v3057_v0 = vpop.f32.mrb[52].mxu0 }
 0x521   :  { %v1924_v7 = vpop.f32.mrb[53].mxu0  ;;  %v1988_v6 = vmul.f32 %v3378_v12, %v3057_v0 }
 0x522   :  { %v1987_v61 = vmul.f32 %v3376_v28, %v1924_v7 }
 0x524   :  { %3087 = vmatprep.mubr.msk.f32.mxu0 %vm950_vm0, %v1987_v61 }
 0x525   :  { %v3060_v44 = vpop.f32.mrb[54].mxu0  ;;  %3088 = vmatmul.mubr.msk.f32.gmra.mrb[68].mxu0 %vm950_vm0, %v1988_v6 }
 0x526   :  { %v1934_v35 = vpop.f32.mrb[55].mxu0  ;;  %v1990_v41 = vmul.f32 %v3382_v38, %v3060_v44 }
 0x527   :  { %v1989_v40 = vmul.f32 %v3380_v2, %v1934_v35 }
 0x529   :  { %3090 = vmatprep.mubr.msk.f32.mxu0 %vm950_vm0, %v1989_v40 }
 0x52a   :  { %3091 = vmatmul.mubr.msk.f32.gmra.mrb[70].mxu0 %vm950_vm0, %v1990_v41  ;;  %v2197_v41 = vpop.permute.xlu0 %2196 }
 0x52e   :  { %v2203_v47 = vpop.permute.xlu0 %2202 }
 0x534   :  { %v3063_v46 = vpop.f32.mrb[56].mxu0 }
 0x535   :  { %v1944_v51 = vpop.f32.mrb[57].mxu0  ;;  %v1992_v57 = vmul.f32 %v3386_v53, %v3063_v46  ;;  %v2201_v46 = vpop.permute.xlu1 %2200 }
 0x536   :  { %v1991_v52 = vmul.f32 %v3384_v48, %v1944_v51  ;;  %v2207_v48 = vpop.permute.xlu0 %2206 }
 0x538   :  { %v3066_v54 = vpop.f32.mrb[58].mxu0  ;;  %3093 = vmatprep.mubr.msk.f32.mxu0 %vm950_vm0, %v1991_v52 }
 0x539   :  { %v1954_v58 = vpop.f32.mrb[59].mxu0  ;;  %3094 = vmatmul.mubr.msk.f32.gmra.mrb[72].mxu0 %vm950_vm0, %v1992_v57  ;;  %v1994_v31 = vmul.f32 %v3390_v49, %v3066_v54  ;;  %v2205_v51 = vpop.permute.xlu1 %2204 }
 0x53a   :  { %v1993_v55 = vmul.f32 %v3388_v43, %v1954_v58  ;;  %v2211_v53 = vpop.permute.xlu0 %2210 }
 0x53c   :  { %3096 = vmatprep.mubr.msk.f32.mxu0 %vm950_vm0, %v1993_v55 }
 0x53d   :  { %3097 = vmatmul.mubr.msk.f32.gmra.mrb[74].mxu0 %vm950_vm0, %v1994_v31  ;;  %v2209_v52 = vpop.permute.xlu1 %2208 }
 0x53e   :  { %v2215_v57 = vpop.permute.xlu0 %2214 }
 0x541   :  { %v2213_v54 = vpop.permute.xlu1 %2212 }
 0x542   :  { %v2219_v43 = vpop.permute.xlu0 %2218 }
 0x545   :  { %v2217_v58 = vpop.permute.xlu1 %2216 }
 0x546   :  { %v2223_v49 = vpop.permute.xlu0 %2222 }
 0x549   :  { %v2221_v55 = vpop.permute.xlu1 %2220 }
 0x54a   :  { %v4368_v31 = vpop.permute.xlu0 %2226 }
 0x5d4   :  { %v3077_v59 = vpop.f32.mrb[60].mxu0 }
 0x5d5   :  { %v2123_v32 = vadd.f32 %v3077_v59, %v3908_v10  ;;  %v2117_v33 = vpop.f32.mrb[61].mxu0  ;;  %v2310_v59 = vsel %vm2308_vm5, %v3914_v13, %v2199_v45  ;;  %v2311_v13 = vsel %vm2308_vm5, %v3920_v15, %v2201_v46 }
 0x5d6   :  { %v2118_v37 = vadd.f32 %v2117_v33, %v3908_v10  ;;  %v2309_v33 = vsel %vm2308_vm5, %v3916_v24, %v2197_v41 }
 0x5d7   :  { %2262 = vrot.lane.b32.xlu0 %v2123_v32, %s3421_s9 }
 0x5d8   :  { %v3080_v56 = vpop.f32.mrb[62].mxu0  ;;  %2260 = vrot.lane.b32.xlu1 %v2118_v37, %s3421_s9 }
 0x5d9   :  { %v2133_v9 = vadd.f32 %v3080_v56, %v3908_v10  ;;  %v2127_v63 = vpop.f32.mrb[63].mxu0 }
 0x5da   :  { %v2128_v5 = vadd.f32 %v2127_v63, %v3908_v10  ;;  %v2312_v63 = vsel %vm2308_vm5, %v3918_v14, %v2203_v47  ;;  %v2313_v14 = vsel %vm2308_vm5, %v3924_v17, %v2205_v51 }
 0x5db   :  { %2266 = vrot.lane.b32.xlu0 %v2133_v9, %s3421_s9 }
 0x5dc   :  { %v3083_v11 = vpop.f32.mrb[64].mxu0  ;;  %2264 = vrot.lane.b32.xlu1 %v2128_v5, %s3421_s9 }
 0x5dd   :  { %v2143_v50 = vadd.f32 %v3083_v11, %v3908_v10  ;;  %v2137_v8 = vpop.f32.mrb[65].mxu0 }
 0x5de   :  { %v2138_v3 = vadd.f32 %v2137_v8, %v3908_v10  ;;  %v2314_v8 = vsel %vm2308_vm5, %v3922_v16, %v2207_v48  ;;  %v2315_v16 = vsel %vm2308_vm5, %v3928_v19, %v2209_v52 }
 0x5df   :  { %2270 = vrot.lane.b32.xlu0 %v2143_v50, %s3421_s9 }
 0x5e0   :  { %v3086_v30 = vpop.f32.mrb[66].mxu0  ;;  %2268 = vrot.lane.b32.xlu1 %v2138_v3, %s3421_s9 }
 0x5e1   :  { %v2153_v60 = vadd.f32 %v3086_v30, %v3908_v10  ;;  %v2147_v1 = vpop.f32.mrb[67].mxu0 }
 0x5e2   :  { %v2148_v62 = vadd.f32 %v2147_v1, %v3908_v10  ;;  %v2316_v1 = vsel %vm2308_vm5, %v3926_v18, %v2211_v53  ;;  %v2317_v18 = vsel %vm2308_vm5, %v3932_v21, %v2213_v54 }
 0x5e3   :  { %2274 = vrot.lane.b32.xlu0 %v2153_v60, %s3421_s9 }
 0x5e4   :  { %2272 = vrot.lane.b32.xlu1 %v2148_v62, %s3421_s9 }
 0x5f8   :  { %v3089_v4 = vpop.f32.mrb[68].mxu0 }
 0x5f9   :  { %v2163_v36 = vadd.f32 %v3089_v4, %v3908_v10  ;;  %v2157_v25 = vpop.f32.mrb[69].mxu0 }
 0x5fa   :  { %v2158_v0 = vadd.f32 %v2157_v25, %v3908_v10  ;;  %v2318_v25 = vsel %vm2308_vm5, %v3930_v20, %v2215_v57  ;;  %v2319_v20 = vsel %vm2308_vm5, %v3936_v23, %v2217_v58 }
 0x5fb   :  { %2278 = vrot.lane.b32.xlu0 %v2163_v36, %s3421_s9 }
 0x5fc   :  { %2276 = vrot.lane.b32.xlu1 %v2158_v0, %s3421_s9 }
 0x5fd   :  { %v3092_v28 = vpop.f32.mrb[70].mxu0 }
 0x5fe   :  { %v2173_v7 = vadd.f32 %v3092_v28, %v3908_v10  ;;  %v2167_v12 = vpop.f32.mrb[71].mxu0 }
 0x5ff   :  { %v2168_v61 = vadd.f32 %v2167_v12, %v3908_v10  ;;  %v2320_v12 = vsel %vm2308_vm5, %v3934_v22, %v2219_v43  ;;  %v2321_v22 = vsel %vm2308_vm5, %v3940_v26, %v2221_v55 }
 0x600   :  { %2282 = vrot.lane.b32.xlu0 %v2173_v7, %s3421_s9 }
 0x601   :  { %2280 = vrot.lane.b32.xlu1 %v2168_v61, %s3421_s9 }
 0x60c   :  { %v3095_v6 = vpop.f32.mrb[72].mxu0 }
 0x60d   :  { %v2183_v44 = vadd.f32 %v3095_v6, %v3908_v10  ;;  %v2177_v2 = vpop.f32.mrb[73].mxu0 }
 0x60e   :  { %v2178_v34 = vadd.f32 %v2177_v2, %v3908_v10  ;;  %v2322_v2 = vsel %vm2308_vm5, %v3938_v42, %v2223_v49 }
 0x60f   :  { %2286 = vrot.lane.b32.xlu0 %v2183_v44, %s3421_s9 }
 0x610   :  { %2284 = vrot.lane.b32.xlu1 %v2178_v34, %s3421_s9  ;;  %v3098_v35 = vpop.f32.mrb[74].mxu0 }
 0x611   :  { %v2193_v38 = vadd.f32 %v3098_v35, %v3908_v10  ;;  %v2187_v39 = vpop.f32.mrb[75].mxu0 }
 0x612   :  { %v2188_v40 = vadd.f32 %v2187_v39, %v3908_v10  ;;  %v4370_v10 = vpop.permute.xlu1 %2224  ;;  %v2324_v39 = vsel %vm2308_vm5, %v3942_v27, %v4368_v31 }
 0x613   :  { %2290 = vrot.lane.b32.xlu0 %v2193_v38, %s3421_s9  ;;  %v2323_v26 = vsel %vm2308_vm5, %v3944_v29, %v4370_v10 }
 0x614   :  { %2288 = vrot.lane.b32.xlu1 %v2188_v40, %s3421_s9 }
 0x649   :  { %v2263_v32 = vpop.permute.xlu0 %2262 }
 0x64a   :  { %v2327_v37 = vsel %vm2325_vm6, %v2310_v59, %v2263_v32  ;;  %v2261_v56 = vpop.permute.xlu1 %2260 }
 0x64b   :  { %2344 = vst.msk [vmem:[#allocation2 + $0x8] sm:$0xff] %vm2342_vm7, %v2327_v37  ;;  %v2326_v9 = vsel %vm2325_vm6, %v2309_v33, %v2261_v56 }
 0x64c   :  { %2343 = vst.msk [vmem:[#allocation2] sm:$0xff] %vm2342_vm7, %v2326_v9 }
 0x64d   :  { %v2267_v5 = vpop.permute.xlu0 %2266 }
 0x64e   :  { %v2329_v11 = vsel %vm2325_vm6, %v2312_v63, %v2267_v5  ;;  %v2265_v50 = vpop.permute.xlu1 %2264 }
 0x64f   :  { %2346 = vst.msk [vmem:[#allocation2 + $0x18] sm:$0xff] %vm2342_vm7, %v2329_v11  ;;  %v2328_v24 = vsel %vm2325_vm6, %v2311_v13, %v2265_v50 }
 0x650   :  { %2345 = vst.msk [vmem:[#allocation2 + $0x10] sm:$0xff] %vm2342_vm7, %v2328_v24 }
 0x651   :  { %v2271_v3 = vpop.permute.xlu0 %2270 }
 0x652   :  { %v2331_v30 = vsel %vm2325_vm6, %v2314_v8, %v2271_v3  ;;  %v2269_v60 = vpop.permute.xlu1 %2268 }
 0x653   :  { %2348 = vst.msk [vmem:[#allocation2 + $0x28] sm:$0xff] %vm2342_vm7, %v2331_v30  ;;  %v2330_v15 = vsel %vm2325_vm6, %v2313_v14, %v2269_v60 }
 0x654   :  { %2347 = vst.msk [vmem:[#allocation2 + $0x20] sm:$0xff] %vm2342_vm7, %v2330_v15 }
 0x655   :  { %v2275_v62 = vpop.permute.xlu0 %2274 }
 0x656   :  { %v2333_v4 = vsel %vm2325_vm6, %v2316_v1, %v2275_v62  ;;  %v2273_v36 = vpop.permute.xlu1 %2272 }
 0x657   :  { %2350 = vst.msk [vmem:[#allocation2 + $0x38] sm:$0xff] %vm2342_vm7, %v2333_v4  ;;  %v2332_v17 = vsel %vm2325_vm6, %v2315_v16, %v2273_v36 }
 0x658   :  { %2349 = vst.msk [vmem:[#allocation2 + $0x30] sm:$0xff] %vm2342_vm7, %v2332_v17 }
 0x66d   :  { %v2279_v0 = vpop.permute.xlu0 %2278 }
 0x66e   :  { %v2335_v28 = vsel %vm2325_vm6, %v2318_v25, %v2279_v0  ;;  %v2277_v7 = vpop.permute.xlu1 %2276 }
 0x66f   :  { %2352 = vst.msk [vmem:[#allocation2 + $0x48] sm:$0xff] %vm2342_vm7, %v2335_v28  ;;  %v2334_v19 = vsel %vm2325_vm6, %v2317_v18, %v2277_v7 }
 0x670   :  { %2351 = vst.msk [vmem:[#allocation2 + $0x40] sm:$0xff] %vm2342_vm7, %v2334_v19 }
 0x672   :  { %v2283_v61 = vpop.permute.xlu0 %2282 }
 0x673   :  { %v2337_v6 = vsel %vm2325_vm6, %v2320_v12, %v2283_v61  ;;  %v2281_v44 = vpop.permute.xlu1 %2280 }
 0x674   :  { %2354 = vst.msk [vmem:[#allocation2 + $0x58] sm:$0xff] %vm2342_vm7, %v2337_v6  ;;  %v2336_v21 = vsel %vm2325_vm6, %v2319_v20, %v2281_v44 }
 0x675   :  { %2353 = vst.msk [vmem:[#allocation2 + $0x50] sm:$0xff] %vm2342_vm7, %v2336_v21 }
 0x681   :  { %v2287_v34 = vpop.permute.xlu0 %2286 }
 0x682   :  { %v2339_v35 = vsel %vm2325_vm6, %v2322_v2, %v2287_v34  ;;  %v2285_v38 = vpop.permute.xlu1 %2284 }
 0x683   :  { %2356 = vst.msk [vmem:[#allocation2 + $0x68] sm:$0xff] %vm2342_vm7, %v2339_v35  ;;  %v2338_v23 = vsel %vm2325_vm6, %v2321_v22, %v2285_v38 }
 0x684   :  { %2355 = vst.msk [vmem:[#allocation2 + $0x60] sm:$0xff] %vm2342_vm7, %v2338_v23 }
 0x685   :  { %v2291_v42 = vpop.permute.xlu0 %2290 }
 0x686   :  { %v2341_v40 = vsel %vm2325_vm6, %v2324_v39, %v2291_v42  ;;  %v2289_v41 = vpop.permute.xlu1 %2288 }
 0x687   :  { %2358 = vst.msk [vmem:[#allocation2 + $0x78] sm:$0xff] %vm2342_vm7, %v2341_v40  ;;  %v2340_v45 = vsel %vm2325_vm6, %v2323_v26, %v2289_v41 }
 0x688   :  { %2357 = vst.msk [vmem:[#allocation2 + $0x70] sm:$0xff] %vm2342_vm7, %v2340_v45 }
 0x689   :  { %3402 = shalt.err (!%p3399_p4)
}
 0x68a   :  { %s3403_s17 = scalar_lea.hbm %s4461_s11, 2048 }
 0x68b   :  { %p3404_p5 = scmp.ne.s32.totalorder %s4461_s11, %s3403_s17  ;;  %p3407_p6 = scmp.lt.u32.totalorder %s3403_s17, %s4461_s11 }
 0x68d   :  { %p3409_p7 = pnand %p3407_p6, %p3404_p5 }
 0x68f   :  { %3412 = shalt.err (!%p3409_p7)
}
 0x690   :  { %s3423_s5 = smov 128   ;;  %s3424_s8 = smov 8  }
 0x691   :  { %2370 = dma.vmem_to_hbm [thread:$0]  %s2365_s14, 2048, %s4461_s11, [#allocation3], %s3423_s5, %s3423_s5, %s3424_s8  }
 0x692   :  { %3413 = dma.done.wait [#allocation3], 2048  }
 0x693   :  { %3414 = vsyncadd [#allocation3], 4294965248 }
 0x694   :  { %2374 = vsyncpa [#allocation3], 1 }

</bundles_post_ra>
